<compile_context>
chip_gen: v7x
topology: tpu7x:2x2x1
jax: 0.10.0
libtpu: 0.0.40
codegen_flags: <defaults>
</compile_context>

<pallas_src>
import jax
import jax.numpy as jnp
import numpy as np
from jax.experimental import pallas as pl
from jax.experimental.pallas import tpu as pltpu


# MXU operand dtype.  jnp.float32 (default, exact vs f32 reference) or
# jnp.bfloat16 (~3x MXU throughput on v6e/v7x once the kernel is MXU-bound).
MATMUL_DTYPE = jnp.float32


# ----------------------------- Pallas kernel --------------------------------

def make_gated_gnn_kernel(n_nodes, f_in, hidden, n_class, mm_dtype):
    NN, FF, HH, CC = n_nodes, f_in, hidden, n_class

    def kernel(x_ref, as_ref, w32_ref, wg_ref, b_ref, o_ref):
        def mm(a, b):
            return jnp.dot(a.astype(mm_dtype), b.astype(mm_dtype),
                           preferred_element_type=jnp.float32)

        # --- weights: static, sublane-aligned views of the two packs --------
        w_first = w32_ref[0:FF, :]                          # [F, H]
        w_con1 = w32_ref[FF:FF + 2 * HH, :]                 # [2H, H] = [Wa; Wb]
        w_lin1 = w32_ref[FF + 2 * HH:FF + 3 * HH, :]        # [H, H]
        w_con2 = w32_ref[FF + 3 * HH:FF + 5 * HH, :]        # [2H, H]
        w_out = w32_ref[FF + 5 * HH:FF + 6 * HH, :]         # [H, H] (cols>=C zero)
        w_i = wg_ref[0:HH, :]                               # [H, 3H] (r|z|n)
        w_h = wg_ref[HH:2 * HH, :]                          # [H, 3H]

        # --- biases: load the pack once; hoist GRU broadcasts (used twice) --
        b_all = b_ref[...]                                   # [8, 3H] f32
        b_first = b_all[0:1, 0:HH]
        b_con1 = b_all[1:2, 0:HH]
        b_lin1 = b_all[2:3, 0:HH]
        b_con2 = b_all[3:4, 0:HH]
        b_out = b_all[4:5, 0:HH]                             # lanes >= C are 0
        b_i = jnp.broadcast_to(b_all[5:6, :], (NN, 3 * HH))
        b_h = jnp.broadcast_to(b_all[6:7, :], (NN, 3 * HH))

        A_s = as_ref[...]                                    # [2N, N] = [A; A_re]

        def gru(xin, hin):
            # Fused PyTorch GRUCell: one matmul per side, slice r/z/n gates.
            gi = mm(xin, w_i) + b_i                          # [N, 3H]
            gh = mm(hin, w_h) + b_h                          # [N, 3H]
            r = jax.nn.sigmoid(gi[:, 0:HH] + gh[:, 0:HH])
            z = jax.nn.sigmoid(gi[:, HH:2 * HH] + gh[:, HH:2 * HH])
            cand = jnp.tanh(gi[:, 2 * HH:3 * HH] + r * gh[:, 2 * HH:3 * HH])
            return (1.0 - z) * cand + z * hin

        def conv_block(xin, w_con, b_con):
            # Both conv directions in one MXU pass, then one K=2H contraction.
            x12 = mm(A_s, xin)                               # [2N, H]
            xcat = jnp.concatenate(
                [x12[0:NN, :], x12[NN:2 * NN, :]], axis=1)   # [N, 2H] = [x1|x2]
            return mm(xcat, w_con) + b_con                   # [N, H]

        # first_lin  (+ F.dropout(p=0.5) -> identity in eval mode)
        hstate = mm(x_ref[...], w_first) + b_first

        # layer 1: conv1(fwd/rev) -> con_lin1 -> GRU
        xc = conv_block(hstate, w_con1, b_con1)
        hstate = gru(xc, hstate)

        # lin1  (+ F.dropout(p=0.2) -> identity in eval mode)
        x = mm(hstate, w_lin1) + b_lin1

        # layer 2: conv2(fwd/rev) -> con_lin2 -> GRU
        xc = conv_block(x, w_con2, b_con2)
        x = gru(xc, hstate)

        # out + log_softmax(dim=-1)
        logits = mm(x, w_out) + b_out                        # [N, H]
        if CC == 2:
            # Explicit 2-class log_softmax: no cross-lane XLU reduce needed.
            l0 = logits[:, 0:1]
            l1 = logits[:, 1:2]
            m = jnp.maximum(l0, l1)
            lse = m + jnp.log(1.0 + jnp.exp(-jnp.abs(l0 - l1)))
            o_ref[...] = logits[:, 0:CC] - lse
        else:
            # General path: lane-masked reduce over the padded H-wide logits.
            col = jax.lax.broadcasted_iota(jnp.int32, (NN, HH), 1)
            valid = col < CC
            lg = jnp.where(valid, logits, jnp.float32(-1e30))
            m = jnp.max(lg, axis=-1, keepdims=True)
            s = logits - m
            e = jnp.where(valid, jnp.exp(s), 0.0)
            lse = jnp.log(jnp.sum(e, axis=-1, keepdims=True))
            o_ref[...] = (s - lse)[:, 0:CC]

    return kernel


# ------------------------- wrapper / param packing --------------------------

def pack_params(p, matmul_dtype):
    """Pack the 24 per-layer parameters into 3 arrays."""
    H = p["W_lin1"].shape[0]
    C = p["W_out"].shape[1]

    w_out_pad = jnp.zeros((H, H), jnp.float32).at[:, :C].set(p["W_out"])
    # Rows: [0:F] first_lin, [F:F+2H] con_lin1 (a;b), [..:+H] lin1,
    #       [..:+2H] con_lin2 (a;b), [..:+H] out (zero-padded to H cols).
    W32 = jnp.concatenate(
        [p["W_first"],
         p["W_con1_a"], p["W_con1_b"],
         p["W_lin1"],
         p["W_con2_a"], p["W_con2_b"],
         w_out_pad], axis=0).astype(matmul_dtype)

    Wg = jnp.concatenate(
        [jnp.concatenate([p["W_ir"], p["W_iz"], p["W_in"]], axis=1),
         jnp.concatenate([p["W_hr"], p["W_hz"], p["W_hn"]], axis=1)],
        axis=0).astype(matmul_dtype)                         # [2H, 3H]

    def pad3h(b):                                            # (1,H) -> (1,3H)
        return jnp.pad(b, ((0, 0), (0, 2 * H)))

    b_out_pad = jnp.zeros((1, H), jnp.float32).at[:, :C].set(p["b_out"])
    B = jnp.concatenate(
        [pad3h(p["b_first"]), pad3h(p["b_con1"]), pad3h(p["b_lin1"]),
         pad3h(p["b_con2"]), pad3h(b_out_pad),
         jnp.concatenate([p["b_ir"], p["b_iz"], p["b_in"]], axis=1),
         jnp.concatenate([p["b_hr"], p["b_hz"], p["b_hn"]], axis=1),
         jnp.zeros((1, 3 * H), jnp.float32)], axis=0).astype(jnp.float32)

    return W32, Wg, B                                        # [F+6H,H],[2H,3H],[8,3H]


def gated_gnn_forward(x, A, A_re, params, matmul_dtype=None):
    if matmul_dtype is None:
        matmul_dtype = MATMUL_DTYPE
    n, f = x.shape
    h = params["W_lin1"].shape[0]
    c = params["W_out"].shape[1]

    W32, Wg, B = pack_params(params, matmul_dtype)
    A_s = jnp.concatenate([A, A_re], axis=0).astype(matmul_dtype)   # [2N, N]

    kernel = make_gated_gnn_kernel(n, f, h, c, matmul_dtype)
    vmem = pl.BlockSpec(memory_space=pltpu.MemorySpace.VMEM)
    # Single graph -> one grid point; everything (<100 KiB) lives in VMEM.
    # TODO(synk): for multi-graph inference on v7x, add a leading batch grid
    # axis with dimension_semantics=("parallel",) so both TensorCores are used;
    # for large N, tile A_s over rows with BlockSpec((TM, N), ...) while keeping
    # the weight packs resident via index maps returning (0, 0) (v7x's 64 MiB
    # VMEM needs roughly half the row-tile of v5e/v6e).
    return pl.pallas_call(
        kernel,
        out_shape=jax.ShapeDtypeStruct((n, c), jnp.float32),
        in_specs=[vmem] * 5,
        out_specs=vmem,
    )(x, A_s, W32, Wg, B)


# -------------------- glue: params, adjacency, reference --------------------

def init_params(key, features_num=32, hidden=32, num_class=2):
    keys = jax.random.split(key, 20)

    def w(k, shape, scale=0.1):
        return (scale * jax.random.normal(k, shape)).astype(jnp.float32)

    def b(k, dim, scale=0.05):
        return (scale * jax.random.normal(k, (1, dim))).astype(jnp.float32)

    p = {}
    p["W_first"] = w(keys[0], (features_num, hidden))
    p["b_first"] = b(keys[1], hidden)
    p["W_con1_a"] = w(keys[2], (hidden, hidden))
    p["W_con1_b"] = w(keys[3], (hidden, hidden))
    p["b_con1"] = b(keys[4], hidden)
    p["W_con2_a"] = w(keys[5], (hidden, hidden))
    p["W_con2_b"] = w(keys[6], (hidden, hidden))
    p["b_con2"] = b(keys[7], hidden)
    p["W_lin1"] = w(keys[8], (hidden, hidden))
    p["b_lin1"] = b(keys[9], hidden)
    # GRUCell weights stored as [H, H] (transposed vs PyTorch's [3H, H]) per gate.
    p["W_ir"] = w(keys[10], (hidden, hidden))
    p["W_iz"] = w(keys[11], (hidden, hidden))
    p["W_in"] = w(keys[12], (hidden, hidden))
    p["W_hr"] = w(keys[13], (hidden, hidden))
    p["W_hz"] = w(keys[14], (hidden, hidden))
    p["W_hn"] = w(keys[15], (hidden, hidden))
    p["b_ir"] = b(keys[16], hidden)
    p["b_iz"] = b(keys[17], hidden)
    p["b_in"] = b(keys[18], hidden)
    p["b_hr"] = jnp.zeros((1, hidden), jnp.float32)
    p["b_hz"] = jnp.zeros((1, hidden), jnp.float32)
    p["b_hn"] = jnp.zeros((1, hidden), jnp.float32)
    p["W_out"] = w(keys[19], (hidden, num_class))
    p["b_out"] = jnp.zeros((1, num_class), jnp.float32)
    return p


def edges_to_dense(edge_index, edge_weight, num_nodes):
    # MessagePassing(aggr='add', flow='source_to_target'):
    #   out[i] = sum_{e: dst_e == i} edge_weight_e * x[src_e]  ==  (A @ x)[i]
    src = edge_index[0]
    dst = edge_index[1]
    A = jnp.zeros((num_nodes, num_nodes), jnp.float32)
    return A.at[dst, src].add(edge_weight)


def reference_forward(x, A, A_re, p):
    """Faithful f32 re-statement of GatedGNN_di.forward (eval mode)."""
    def gru(xin, hin):
        r = jax.nn.sigmoid(xin @ p["W_ir"] + p["b_ir"] + hin @ p["W_hr"] + p["b_hr"])
        z = jax.nn.sigmoid(xin @ p["W_iz"] + p["b_iz"] + hin @ p["W_hz"] + p["b_hz"])
        n = jnp.tanh(xin @ p["W_in"] + p["b_in"] + r * (hin @ p["W_hn"] + p["b_hn"]))
        return (1.0 - z) * n + z * hin

    x = x @ p["W_first"] + p["b_first"]
    h = x
    xc = (A @ x) @ p["W_con1_a"] + (A_re @ x) @ p["W_con1_b"] + p["b_con1"]
    x = gru(xc, h)
    h = x
    x = x @ p["W_lin1"] + p["b_lin1"]
    xc = (A @ x) @ p["W_con2_a"] + (A_re @ x) @ p["W_con2_b"] + p["b_con2"]
    x = gru(xc, h)
    logits = x @ p["W_out"] + p["b_out"]
    return jax.nn.log_softmax(logits, axis=-1)


if __name__ == "__main__":
    N, F, H, C, E = 64, 32, 32, 2, 128

    key = jax.random.PRNGKey(0)
    kx, ke, kw, kp = jax.random.split(key, 4)

    x = jax.random.normal(kx, (N, F), dtype=jnp.float32)
    edge_index = jax.random.randint(ke, (2, E), 0, N, dtype=jnp.int32)
    edge_weight = jax.random.uniform(kw, (E,), dtype=jnp.float32)
    # Directed graph: reverse edges (data.edge_index_re default) with same weights.
    edge_index_re = edge_index[jnp.array([1, 0]), :]
    edge_weight_re = edge_weight

    params = init_params(kp, features_num=F, hidden=H, num_class=C)

    A = edges_to_dense(edge_index, edge_weight, N)
    A_re = edges_to_dense(edge_index_re, edge_weight_re, N)

    out = jax.block_until_ready(gated_gnn_forward(x, A, A_re, params))
    ref = jax.block_until_ready(reference_forward(x, A, A_re, params))

    tol = 1e-4 if MATMUL_DTYPE == jnp.float32 else 2e-2
    np.testing.assert_allclose(np.asarray(out), np.asarray(ref), rtol=tol, atol=tol)

    print("KERNEL_OK")
</pallas_src>

<mosaic_0001>
module attributes {stable_mosaic.version = 11 : i64} {
  func.func @kernel(%arg0: memref<64x32xf32, #tpu.memory_space<vmem>>, %arg1: memref<128x64xf32, #tpu.memory_space<vmem>>, %arg2: memref<224x32xf32, #tpu.memory_space<vmem>>, %arg3: memref<64x96xf32, #tpu.memory_space<vmem>>, %arg4: memref<8x96xf32, #tpu.memory_space<vmem>>, %arg5: memref<64x2xf32, #tpu.memory_space<vmem>>) attributes {dimension_semantics = [], scalar_prefetch = 0 : i64, scratch_operands = 0 : i64, tpu.core_type = #tpu.core_type<tc>} {
    %c0 = arith.constant 0 : index
    %c0_0 = arith.constant 0 : index
    %0 = vector.load %arg2[%c0, %c0_0] : memref<224x32xf32, #tpu.memory_space<vmem>>, vector<32x32xf32>
    %c32 = arith.constant 32 : index
    %c0_1 = arith.constant 0 : index
    %1 = vector.load %arg2[%c32, %c0_1] : memref<224x32xf32, #tpu.memory_space<vmem>>, vector<64x32xf32>
    %c96 = arith.constant 96 : index
    %c0_2 = arith.constant 0 : index
    %2 = vector.load %arg2[%c96, %c0_2] : memref<224x32xf32, #tpu.memory_space<vmem>>, vector<32x32xf32>
    %c128 = arith.constant 128 : index
    %c0_3 = arith.constant 0 : index
    %3 = vector.load %arg2[%c128, %c0_3] : memref<224x32xf32, #tpu.memory_space<vmem>>, vector<64x32xf32>
    %c192 = arith.constant 192 : index
    %c0_4 = arith.constant 0 : index
    %4 = vector.load %arg2[%c192, %c0_4] : memref<224x32xf32, #tpu.memory_space<vmem>>, vector<32x32xf32>
    %c0_5 = arith.constant 0 : index
    %c0_6 = arith.constant 0 : index
    %5 = vector.load %arg3[%c0_5, %c0_6] : memref<64x96xf32, #tpu.memory_space<vmem>>, vector<32x96xf32>
    %c32_7 = arith.constant 32 : index
    %c0_8 = arith.constant 0 : index
    %6 = vector.load %arg3[%c32_7, %c0_8] : memref<64x96xf32, #tpu.memory_space<vmem>>, vector<32x96xf32>
    %c0_9 = arith.constant 0 : index
    %c0_10 = arith.constant 0 : index
    %7 = vector.load %arg4[%c0_9, %c0_10] : memref<8x96xf32, #tpu.memory_space<vmem>>, vector<8x96xf32>
    %8 = vector.extract_strided_slice %7 {offsets = [0, 0], sizes = [1, 32], strides = [1, 1]} : vector<8x96xf32> to vector<1x32xf32>
    %9 = vector.extract_strided_slice %7 {offsets = [1, 0], sizes = [1, 32], strides = [1, 1]} : vector<8x96xf32> to vector<1x32xf32>
    %10 = vector.extract_strided_slice %7 {offsets = [2, 0], sizes = [1, 32], strides = [1, 1]} : vector<8x96xf32> to vector<1x32xf32>
    %11 = vector.extract_strided_slice %7 {offsets = [3, 0], sizes = [1, 32], strides = [1, 1]} : vector<8x96xf32> to vector<1x32xf32>
    %12 = vector.extract_strided_slice %7 {offsets = [4, 0], sizes = [1, 32], strides = [1, 1]} : vector<8x96xf32> to vector<1x32xf32>
    %13 = vector.extract_strided_slice %7 {offsets = [5, 0], sizes = [1, 96], strides = [1, 1]} : vector<8x96xf32> to vector<1x96xf32>
    %14 = vector.shape_cast %13 : vector<1x96xf32> to vector<1x96xf32>
    %15 = vector.broadcast %14 : vector<1x96xf32> to vector<64x96xf32>
    %16 = vector.extract_strided_slice %7 {offsets = [6, 0], sizes = [1, 96], strides = [1, 1]} : vector<8x96xf32> to vector<1x96xf32>
    %17 = vector.shape_cast %16 : vector<1x96xf32> to vector<1x96xf32>
    %18 = vector.broadcast %17 : vector<1x96xf32> to vector<64x96xf32>
    %c0_11 = arith.constant 0 : index
    %c0_12 = arith.constant 0 : index
    %19 = vector.load %arg1[%c0_11, %c0_12] : memref<128x64xf32, #tpu.memory_space<vmem>>, vector<128x64xf32>
    %c0_13 = arith.constant 0 : index
    %c0_14 = arith.constant 0 : index
    %20 = vector.load %arg0[%c0_13, %c0_14] : memref<64x32xf32, #tpu.memory_space<vmem>>, vector<64x32xf32>
    %cst = arith.constant dense<0.000000e+00> : vector<64x32xf32>
    %21 = tpu.matmul %20, %0, %cst {dimension_numbers = #tpu.dot_dimension_numbers<[1], [0], [0], [1], [0, 0, 1, 1], [], []>} : vector<64x32xf32>, vector<32x32xf32>, vector<64x32xf32> -> vector<64x32xf32>
    %22 = vector.broadcast %8 : vector<1x32xf32> to vector<64x32xf32>
    %23 = arith.addf %21, %22 : vector<64x32xf32>
    %cst_15 = arith.constant dense<0.000000e+00> : vector<128x32xf32>
    %24 = tpu.matmul %19, %23, %cst_15 {dimension_numbers = #tpu.dot_dimension_numbers<[1], [0], [0], [1], [0, 0, 1, 1], [], []>} : vector<128x64xf32>, vector<64x32xf32>, vector<128x32xf32> -> vector<128x32xf32>
    %25 = vector.extract_strided_slice %24 {offsets = [0, 0], sizes = [64, 32], strides = [1, 1]} : vector<128x32xf32> to vector<64x32xf32>
    %26 = vector.extract_strided_slice %24 {offsets = [64, 0], sizes = [64, 32], strides = [1, 1]} : vector<128x32xf32> to vector<64x32xf32>
    %27 = tpu.concatenate %25, %26 in 1 : vector<64x32xf32>, vector<64x32xf32> -> vector<64x64xf32>
    %cst_16 = arith.constant dense<0.000000e+00> : vector<64x32xf32>
    %28 = tpu.matmul %27, %1, %cst_16 {dimension_numbers = #tpu.dot_dimension_numbers<[1], [0], [0], [1], [0, 0, 1, 1], [], []>} : vector<64x64xf32>, vector<64x32xf32>, vector<64x32xf32> -> vector<64x32xf32>
    %29 = vector.broadcast %9 : vector<1x32xf32> to vector<64x32xf32>
    %30 = arith.addf %28, %29 : vector<64x32xf32>
    %cst_17 = arith.constant dense<0.000000e+00> : vector<64x96xf32>
    %31 = tpu.matmul %30, %5, %cst_17 {dimension_numbers = #tpu.dot_dimension_numbers<[1], [0], [0], [1], [0, 0, 1, 1], [], []>} : vector<64x32xf32>, vector<32x96xf32>, vector<64x96xf32> -> vector<64x96xf32>
    %32 = arith.addf %31, %15 : vector<64x96xf32>
    %cst_18 = arith.constant dense<0.000000e+00> : vector<64x96xf32>
    %33 = tpu.matmul %23, %6, %cst_18 {dimension_numbers = #tpu.dot_dimension_numbers<[1], [0], [0], [1], [0, 0, 1, 1], [], []>} : vector<64x32xf32>, vector<32x96xf32>, vector<64x96xf32> -> vector<64x96xf32>
    %34 = arith.addf %33, %18 : vector<64x96xf32>
    %35 = vector.extract_strided_slice %32 {offsets = [0, 0], sizes = [64, 32], strides = [1, 1]} : vector<64x96xf32> to vector<64x32xf32>
    %36 = vector.extract_strided_slice %34 {offsets = [0, 0], sizes = [64, 32], strides = [1, 1]} : vector<64x96xf32> to vector<64x32xf32>
    %37 = arith.addf %35, %36 : vector<64x32xf32>
    %38 = arith.negf %37 : vector<64x32xf32>
    %39 = math.exp %38 : vector<64x32xf32>
    %cst_19 = arith.constant 1.000000e+00 : f32
    %40 = vector.broadcast %cst_19 : f32 to vector<64x32xf32>
    %41 = arith.addf %40, %39 : vector<64x32xf32>
    %42 = arith.divf %40, %41 : vector<64x32xf32>
    %43 = vector.extract_strided_slice %32 {offsets = [0, 32], sizes = [64, 32], strides = [1, 1]} : vector<64x96xf32> to vector<64x32xf32>
    %44 = vector.extract_strided_slice %34 {offsets = [0, 32], sizes = [64, 32], strides = [1, 1]} : vector<64x96xf32> to vector<64x32xf32>
    %45 = arith.addf %43, %44 : vector<64x32xf32>
    %46 = arith.negf %45 : vector<64x32xf32>
    %47 = math.exp %46 : vector<64x32xf32>
    %cst_20 = arith.constant 1.000000e+00 : f32
    %48 = vector.broadcast %cst_20 : f32 to vector<64x32xf32>
    %49 = arith.addf %48, %47 : vector<64x32xf32>
    %50 = arith.divf %48, %49 : vector<64x32xf32>
    %51 = vector.extract_strided_slice %32 {offsets = [0, 64], sizes = [64, 32], strides = [1, 1]} : vector<64x96xf32> to vector<64x32xf32>
    %52 = vector.extract_strided_slice %34 {offsets = [0, 64], sizes = [64, 32], strides = [1, 1]} : vector<64x96xf32> to vector<64x32xf32>
    %53 = arith.mulf %42, %52 : vector<64x32xf32>
    %54 = arith.addf %51, %53 : vector<64x32xf32>
    %55 = math.tanh %54 : vector<64x32xf32>
    %cst_21 = arith.constant 1.000000e+00 : f32
    %56 = vector.broadcast %cst_21 : f32 to vector<64x32xf32>
    %57 = arith.subf %56, %50 : vector<64x32xf32>
    %58 = arith.mulf %57, %55 : vector<64x32xf32>
    %59 = arith.mulf %50, %23 : vector<64x32xf32>
    %60 = arith.addf %58, %59 : vector<64x32xf32>
    %cst_22 = arith.constant dense<0.000000e+00> : vector<64x32xf32>
    %61 = tpu.matmul %60, %2, %cst_22 {dimension_numbers = #tpu.dot_dimension_numbers<[1], [0], [0], [1], [0, 0, 1, 1], [], []>} : vector<64x32xf32>, vector<32x32xf32>, vector<64x32xf32> -> vector<64x32xf32>
    %62 = vector.broadcast %10 : vector<1x32xf32> to vector<64x32xf32>
    %63 = arith.addf %61, %62 : vector<64x32xf32>
    %cst_23 = arith.constant dense<0.000000e+00> : vector<128x32xf32>
    %64 = tpu.matmul %19, %63, %cst_23 {dimension_numbers = #tpu.dot_dimension_numbers<[1], [0], [0], [1], [0, 0, 1, 1], [], []>} : vector<128x64xf32>, vector<64x32xf32>, vector<128x32xf32> -> vector<128x32xf32>
    %65 = vector.extract_strided_slice %64 {offsets = [0, 0], sizes = [64, 32], strides = [1, 1]} : vector<128x32xf32> to vector<64x32xf32>
    %66 = vector.extract_strided_slice %64 {offsets = [64, 0], sizes = [64, 32], strides = [1, 1]} : vector<128x32xf32> to vector<64x32xf32>
    %67 = tpu.concatenate %65, %66 in 1 : vector<64x32xf32>, vector<64x32xf32> -> vector<64x64xf32>
    %cst_24 = arith.constant dense<0.000000e+00> : vector<64x32xf32>
    %68 = tpu.matmul %67, %3, %cst_24 {dimension_numbers = #tpu.dot_dimension_numbers<[1], [0], [0], [1], [0, 0, 1, 1], [], []>} : vector<64x64xf32>, vector<64x32xf32>, vector<64x32xf32> -> vector<64x32xf32>
    %69 = vector.broadcast %11 : vector<1x32xf32> to vector<64x32xf32>
    %70 = arith.addf %68, %69 : vector<64x32xf32>
    %cst_25 = arith.constant dense<0.000000e+00> : vector<64x96xf32>
    %71 = tpu.matmul %70, %5, %cst_25 {dimension_numbers = #tpu.dot_dimension_numbers<[1], [0], [0], [1], [0, 0, 1, 1], [], []>} : vector<64x32xf32>, vector<32x96xf32>, vector<64x96xf32> -> vector<64x96xf32>
    %72 = arith.addf %71, %15 : vector<64x96xf32>
    %cst_26 = arith.constant dense<0.000000e+00> : vector<64x96xf32>
    %73 = tpu.matmul %60, %6, %cst_26 {dimension_numbers = #tpu.dot_dimension_numbers<[1], [0], [0], [1], [0, 0, 1, 1], [], []>} : vector<64x32xf32>, vector<32x96xf32>, vector<64x96xf32> -> vector<64x96xf32>
    %74 = arith.addf %73, %18 : vector<64x96xf32>
    %75 = vector.extract_strided_slice %72 {offsets = [0, 0], sizes = [64, 32], strides = [1, 1]} : vector<64x96xf32> to vector<64x32xf32>
    %76 = vector.extract_strided_slice %74 {offsets = [0, 0], sizes = [64, 32], strides = [1, 1]} : vector<64x96xf32> to vector<64x32xf32>
    %77 = arith.addf %75, %76 : vector<64x32xf32>
    %78 = arith.negf %77 : vector<64x32xf32>
    %79 = math.exp %78 : vector<64x32xf32>
    %cst_27 = arith.constant 1.000000e+00 : f32
    %80 = vector.broadcast %cst_27 : f32 to vector<64x32xf32>
    %81 = arith.addf %80, %79 : vector<64x32xf32>
    %82 = arith.divf %80, %81 : vector<64x32xf32>
    %83 = vector.extract_strided_slice %72 {offsets = [0, 32], sizes = [64, 32], strides = [1, 1]} : vector<64x96xf32> to vector<64x32xf32>
    %84 = vector.extract_strided_slice %74 {offsets = [0, 32], sizes = [64, 32], strides = [1, 1]} : vector<64x96xf32> to vector<64x32xf32>
    %85 = arith.addf %83, %84 : vector<64x32xf32>
    %86 = arith.negf %85 : vector<64x32xf32>
    %87 = math.exp %86 : vector<64x32xf32>
    %cst_28 = arith.constant 1.000000e+00 : f32
    %88 = vector.broadcast %cst_28 : f32 to vector<64x32xf32>
    %89 = arith.addf %88, %87 : vector<64x32xf32>
    %90 = arith.divf %88, %89 : vector<64x32xf32>
    %91 = vector.extract_strided_slice %72 {offsets = [0, 64], sizes = [64, 32], strides = [1, 1]} : vector<64x96xf32> to vector<64x32xf32>
    %92 = vector.extract_strided_slice %74 {offsets = [0, 64], sizes = [64, 32], strides = [1, 1]} : vector<64x96xf32> to vector<64x32xf32>
    %93 = arith.mulf %82, %92 : vector<64x32xf32>
    %94 = arith.addf %91, %93 : vector<64x32xf32>
    %95 = math.tanh %94 : vector<64x32xf32>
    %cst_29 = arith.constant 1.000000e+00 : f32
    %96 = vector.broadcast %cst_29 : f32 to vector<64x32xf32>
    %97 = arith.subf %96, %90 : vector<64x32xf32>
    %98 = arith.mulf %97, %95 : vector<64x32xf32>
    %99 = arith.mulf %90, %60 : vector<64x32xf32>
    %100 = arith.addf %98, %99 : vector<64x32xf32>
    %cst_30 = arith.constant dense<0.000000e+00> : vector<64x32xf32>
    %101 = tpu.matmul %100, %4, %cst_30 {dimension_numbers = #tpu.dot_dimension_numbers<[1], [0], [0], [1], [0, 0, 1, 1], [], []>} : vector<64x32xf32>, vector<32x32xf32>, vector<64x32xf32> -> vector<64x32xf32>
    %102 = vector.broadcast %12 : vector<1x32xf32> to vector<64x32xf32>
    %103 = arith.addf %101, %102 : vector<64x32xf32>
    %104 = vector.extract_strided_slice %103 {offsets = [0, 0], sizes = [64, 1], strides = [1, 1]} : vector<64x32xf32> to vector<64x1xf32>
    %105 = vector.extract_strided_slice %103 {offsets = [0, 1], sizes = [64, 1], strides = [1, 1]} : vector<64x32xf32> to vector<64x1xf32>
    %106 = arith.maximumf %104, %105 : vector<64x1xf32>
    %107 = arith.subf %104, %105 : vector<64x1xf32>
    %108 = math.absf %107 : vector<64x1xf32>
    %cst_31 = arith.constant 0.000000e+00 : f32
    %109 = vector.broadcast %cst_31 : f32 to vector<64x1xf32>
    %110 = arith.subf %109, %108 : vector<64x1xf32>
    %111 = math.exp %110 : vector<64x1xf32>
    %cst_32 = arith.constant 1.000000e+00 : f32
    %112 = vector.broadcast %cst_32 : f32 to vector<64x1xf32>
    %113 = arith.addf %112, %111 : vector<64x1xf32>
    %114 = math.log %113 : vector<64x1xf32>
    %115 = arith.addf %106, %114 : vector<64x1xf32>
    %116 = vector.extract_strided_slice %103 {offsets = [0, 0], sizes = [64, 2], strides = [1, 1]} : vector<64x32xf32> to vector<64x2xf32>
    %117 = vector.broadcast %115 : vector<64x1xf32> to vector<64x2xf32>
    %118 = arith.subf %116, %117 : vector<64x2xf32>
    %c0_33 = arith.constant 0 : index
    %c0_34 = arith.constant 0 : index
    %119 = vector.load %arg5[%c0_33, %c0_34] : memref<64x2xf32, #tpu.memory_space<vmem>>, vector<64x2xf32>
    tpu.vector_store %arg5[%c0_33, %c0_34], %118 {strides = array<i32>} : memref<64x2xf32, #tpu.memory_space<vmem>>, vector<64x2xf32>,
    return
  }
}

</mosaic_0001>

<bundles_post_ra>
// kernel: tpu_custom_call.1
= control target key start
LH: loop header
LB: loop body
LE: loop exit
PB: predicated region body
PF: predicated region fallthrough
CT: control target
= control target key end

     0   :  { %vm93_vm0 = vcmask 261120   ;;  %vm223_vm1 = vcmask 523264   ;;  %v57_v15 = vlaneseq  ;;  %s3131_s21 = smov 32   ;;  %s3132_s22 = smov 64   ;;  %vm2298_vm2 = vcmask 15360   ;;  %s4142_s2 = inlined_call_operand.vmem [shape: f32[224,32], index: 2, kind: input, shape index: {}]   ;;  %s4143_s0 = inlined_call_operand.vmem [shape: f32[64,32], index: 0, kind: input, shape index: {}]   ;;  %s4144_s1 = inlined_call_operand.vmem [shape: f32[128,64], index: 1, kind: input, shape index: {}]   ;;  %s4145_s4 = inlined_call_operand.vmem [shape: f32[8,96], index: 4, kind: input, shape index: {}]   ;;  %s4146_s3 = inlined_call_operand.vmem [shape: f32[64,96], index: 3, kind: input, shape index: {}]   ;;  %s4147_s5 = inlined_call_operand.vmem [shape: f32[64,2], index: 5, kind: output, shape index: {}]  }
   0x1   :  { %v20_v0 = vld [vmem:[%s4142_s2] sm:$0xff]  ;;  %v21_v1 = vld [vmem:[%s4142_s2 + $0x8] sm:$0xff]  ;;  %v22_v2 = vld [vmem:[%s4142_s2 + $0x10] sm:$0xff] }
   0x2   :  { %v2871_v3 = vpack.c.bf16 %v21_v1, %v20_v0  ;;  %v23_v4 = vld [vmem:[%s4142_s2 + $0x18] sm:$0xff]  ;;  %v81_v5 = vld [vmem:[%s4143_s0] sm:$0xff]  ;;  %v82_v7 = vld [vmem:[%s4143_s0 + $0x8] sm:$0xff]  ;;  %v3217_v16 = vshrl.u32 %v57_v15, 7 }
   0x3   :  { %v2875_v6 = vpack.c.bf16 %v23_v4, %v22_v2  ;;  %2603 = vmatprep.mubr.msk.f32.mxu0 %vm93_vm0, %v81_v5  ;;  %v83_v8 = vld [vmem:[%s4143_s0 + $0x10] sm:$0xff]  ;;  %v84_v9 = vld [vmem:[%s4143_s0 + $0x18] sm:$0xff]  ;;  %v85_v10 = vld [vmem:[%s4143_s0 + $0x20] sm:$0xff] }
   0x4   :  { %2872 = vmatprep.subr.bf16.mxu0 %v2871_v3  ;;  %v86_v11 = vld [vmem:[%s4143_s0 + $0x28] sm:$0xff]  ;;  %v87_v12 = vld [vmem:[%s4143_s0 + $0x30] sm:$0xff]  ;;  %v88_v13 = vld [vmem:[%s4143_s0 + $0x38] sm:$0xff]  ;;  %v91_v17 = vsub.s32 0, %v3217_v16 }
   0x5   :  { %2874 = vmatpush3.bf16.msra.mxu0 %v2871_v3  ;;  %v3213_v14 = vld [vmem:[%s4144_s1] sm:$0xff]  ;;  %v53_v39 = vld [vmem:[%s4146_s3 + $0x28] sm:$0xff]  ;;  %v54_v43 = vld [vmem:[%s4146_s3 + $0x30] sm:$0xff] }
   0x6   :  { %2876 = vmatprep.subr.bf16.mxu0 %v2875_v6  ;;  %2631 = vmatprep.mubr.msk.f32.mxu1 %vm223_vm1, %v3213_v14  ;;  %v3223_v18 = vld [vmem:[%s4145_s4] sm:$0xff]  ;;  %v55_v44 = vld [vmem:[%s4146_s3 + $0x38] sm:$0xff]  ;;  %v3267_v45 = vld [vmem:[%s4144_s1 + $0x8] sm:$0xff] }
   0x7   :  { %v92_v19 = vrot.slane %v3223_v18, %v91_v17  ;;  %v52_v38 = vld [vmem:[%s4146_s3 + $0x20] sm:$0xff]  ;;  %v3272_v46 = vld [vmem:[%s4144_s1 + $0x10] sm:$0xff]  ;;  %v3275_v47 = vpack.c.bf16 %v55_v44, %v54_v43  ;;  %v3284_v48 = vld [vmem:[%s4144_s1 + $0x18] sm:$0xff] }
   0x8   :  { %v3256_v42 = vpack.c.bf16 %v53_v39, %v52_v38  ;;  %v3290_v49 = vld [vmem:[%s4144_s1 + $0x20] sm:$0xff]  ;;  %v3300_v50 = vld [vmem:[%s4144_s1 + $0x28] sm:$0xff]  ;;  %v3306_v51 = vld [vmem:[%s4144_s1 + $0x30] sm:$0xff] }
   0x9   :  { %2878 = vmatpush3.bf16.msra.mxu0 %v2875_v6  ;;  %v3315_v52 = vld [vmem:[%s4144_s1 + $0x38] sm:$0xff]  ;;  %v3320_v53 = vld [vmem:[%s4144_s1 + $0x40] sm:$0xff]  ;;  %v3329_v54 = vld [vmem:[%s4144_s1 + $0x48] sm:$0xff] }
   0xa   :  { %v3334_v55 = vld [vmem:[%s4144_s1 + $0x50] sm:$0xff]  ;;  %v3343_v56 = vld [vmem:[%s4144_s1 + $0x58] sm:$0xff]  ;;  %v3348_v57 = vld [vmem:[%s4144_s1 + $0x60] sm:$0xff] }
   0xb   :  { %v3357_v58 = vld [vmem:[%s4144_s1 + $0x68] sm:$0xff]  ;;  %v3362_v59 = vld [vmem:[%s4144_s1 + $0x70] sm:$0xff]  ;;  %v3371_v60 = vld [vmem:[%s4144_s1 + $0x78] sm:$0xff] }
   0xc   :  { %2604 = vmatmul.mubr.msk.f32.vlgmr.msra.gmra.mrb[0].mxu0 %vm93_vm0, %v82_v7  ;;  %v24_v61 = vld [vmem:[%s4142_s2 + $0x20] sm:$0xff]  ;;  %v25_v62 = vld [vmem:[%s4142_s2 + $0x28] sm:$0xff]  ;;  %v26_v63 = vld [vmem:[%s4142_s2 + $0x30] sm:$0xff] }
   0xd   :  { %2606 = vmatprep.mubr.msk.f32.mxu0 %vm93_vm0, %v83_v8  ;;  %v2895_v0 = vpack.c.bf16 %v25_v62, %v24_v61  ;;  %v27_v1 = vld [vmem:[%s4142_s2 + $0x38] sm:$0xff]  ;;  %v28_v3 = vld [vmem:[%s4142_s2 + $0x40] sm:$0xff]  ;;  %v29_v4 = vld [vmem:[%s4142_s2 + $0x48] sm:$0xff] }
   0xe   :  { %v2899_v2 = vpack.c.bf16 %v27_v1, %v26_v63  ;;  %v2903_v5 = vpack.c.bf16 %v29_v4, %v28_v3  ;;  %v30_v8 = vld [vmem:[%s4142_s2 + $0x50] sm:$0xff]  ;;  %v48_v43 = vld [vmem:[%s4146_s3] sm:$0xff]  ;;  %v49_v44 = vld [vmem:[%s4146_s3 + $0x8] sm:$0xff] }
   0xf   :  { %2896 = vmatprep.subr.bf16.mxu0 %v2895_v0  ;;  %v3457_v62 = vpack.c.bf16 %v49_v44, %v48_v43 }
  0x10   :  { %2607 = vmatmul.mubr.msk.f32.gmra.mrb[2].mxu0 %vm93_vm0, %v84_v9  ;;  %v31_v9 = vld [vmem:[%s4142_s2 + $0x58] sm:$0xff] }
  0x11   :  { %2609 = vmatprep.mubr.msk.f32.mxu0 %vm93_vm0, %v85_v10  ;;  %2898 = vmatpush3.bf16.msra.mxu0 %v2895_v0 }
  0x12   :  { %2900 = vmatprep.subr.bf16.mxu0 %v2899_v2 }
  0x14   :  { %2610 = vmatmul.mubr.msk.f32.gmra.mrb[4].mxu0 %vm93_vm0, %v86_v11  ;;  %v2907_v11 = vpack.c.bf16 %v31_v9, %v30_v8 }
  0x15   :  { %2612 = vmatprep.mubr.msk.f32.mxu0 %vm93_vm0, %v87_v12  ;;  %2902 = vmatpush3.bf16.msra.mxu0 %v2899_v2 }
  0x16   :  { %2904 = vmatprep.subr.bf16.mxu0 %v2903_v5 }
  0x18   :  { %2613 = vmatmul.mubr.msk.f32.gmra.mrb[6].mxu0 %vm93_vm0, %v88_v13 }
  0x19   :  { %2906 = vmatpush3.bf16.msra.mxu0 %v2903_v5 }
  0x1a   :  { %2908 = vmatprep.subr.bf16.mxu0 %v2907_v11 }
  0x1d   :  { %2910 = vmatpush3.bf16.msra.mxu0 %v2907_v11 }
  0x1e   :  { %2912 = vmatprep.subr.bf16.mxu0 %v3457_v62 }
  0xdf   :  { %v2605_v20 = vpop.f32.mrb[0].mxu0 }
  0xe0   :  { %v3226_v21 = vadd.f32 %v2605_v20, %v92_v19  ;;  %v184_v22 = vpop.f32.mrb[1].mxu0 }
  0xe1   :  { %v3228_v23 = vadd.f32 %v184_v22, %v92_v19 }
  0xe3   :  { %v2608_v24 = vpop.f32.mrb[2].mxu0  ;;  %v2879_v25 = vpack.c.bf16 %v3226_v21, %v3228_v23 }
  0xe4   :  { %v3232_v26 = vadd.f32 %v2608_v24, %v92_v19  ;;  %v194_v27 = vpop.f32.mrb[3].mxu0 }
  0xe5   :  { %v3234_v28 = vadd.f32 %v194_v27, %v92_v19  ;;  %2880 = vmatprep.subr.bf16.mxu1 %v2879_v25 }
  0xe6   :  { %2882 = vmatpush3.bf16.msra.mxu1 %v2879_v25 }
  0xe7   :  { %v2611_v29 = vpop.f32.mrb[4].mxu0  ;;  %v2883_v30 = vpack.c.bf16 %v3232_v26, %v3234_v28 }
  0xe8   :  { %v3238_v31 = vadd.f32 %v2611_v29, %v92_v19  ;;  %v204_v32 = vpop.f32.mrb[5].mxu0  ;;  %v63_v29 = vsub.s32 6, %v3217_v16 }
  0xe9   :  { %v3240_v33 = vadd.f32 %v204_v32, %v92_v19  ;;  %2884 = vmatprep.subr.bf16.mxu1 %v2883_v30 }
  0xea   :  { %2886 = vmatpush3.bf16.msra.mxu1 %v2883_v30 }
  0xeb   :  { %v2614_v34 = vpop.f32.mrb[6].mxu0  ;;  %v2887_v35 = vpack.c.bf16 %v3238_v31, %v3240_v33 }
  0xec   :  { %v3244_v36 = vadd.f32 %v2614_v34, %v92_v19  ;;  %v214_v37 = vpop.f32.mrb[7].mxu0  ;;  %v3438_v34 = vrot.slane %v3223_v18, %v63_v29 }
  0xed   :  { %v3252_v40 = vadd.f32 %v214_v37, %v92_v19  ;;  %2888 = vmatprep.subr.bf16.mxu1 %v2887_v35 }
  0xee   :  { %2890 = vmatpush3.bf16.msra.mxu1 %v2887_v35 }
  0xef   :  { %v2891_v41 = vpack.c.bf16 %v3244_v36, %v3252_v40 }
  0xf1   :  { %2892 = vmatprep.subr.bf16.mxu1 %v2891_v41 }
  0xf2   :  { %2894 = vmatpush3.bf16.msra.mxu1 %v2891_v41 }
  0xf3   :  { %2920 = vmatprep.subr.bf16.mxu1 %v3256_v42 }
  0xf5   :  { %2632 = vmatmul.mubr.msk.f32.vlgmr.msra.gmra.mrb[0].mxu1 %vm223_vm1, %v3267_v45 }
  0xf6   :  { %2634 = vmatprep.mubr.msk.f32.mxu1 %vm223_vm1, %v3272_v46  ;;  %2922 = vmatpush3.bf16.msra.mxu1 %v3256_v42 }
  0xf7   :  { %2924 = vmatprep.subr.bf16.mxu1 %v3275_v47 }
  0xf9   :  { %2635 = vmatmul.mubr.msk.f32.gmra.mrb[2].mxu1 %vm223_vm1, %v3284_v48 }
  0xfa   :  { %2637 = vmatprep.mubr.msk.f32.mxu1 %vm223_vm1, %v3290_v49  ;;  %2926 = vmatpush3.bf16.msra.mxu1 %v3275_v47 }
  0xfd   :  { %2638 = vmatmul.mubr.msk.f32.gmra.mrb[4].mxu1 %vm223_vm1, %v3300_v50 }
  0xfe   :  { %2640 = vmatprep.mubr.msk.f32.mxu1 %vm223_vm1, %v3306_v51 }
 0x101   :  { %2641 = vmatmul.mubr.msk.f32.gmra.mrb[6].mxu1 %vm223_vm1, %v3315_v52 }
 0x102   :  { %2643 = vmatprep.mubr.msk.f32.mxu1 %vm223_vm1, %v3320_v53 }
 0x105   :  { %2644 = vmatmul.mubr.msk.f32.gmra.mrb[8].mxu1 %vm223_vm1, %v3329_v54 }
 0x106   :  { %2646 = vmatprep.mubr.msk.f32.mxu1 %vm223_vm1, %v3334_v55 }
 0x109   :  { %2647 = vmatmul.mubr.msk.f32.gmra.mrb[10].mxu1 %vm223_vm1, %v3343_v56 }
 0x10a   :  { %2649 = vmatprep.mubr.msk.f32.mxu1 %vm223_vm1, %v3348_v57 }
 0x10d   :  { %2650 = vmatmul.mubr.msk.f32.gmra.mrb[12].mxu1 %vm223_vm1, %v3357_v58 }
 0x10e   :  { %2652 = vmatprep.mubr.msk.f32.mxu1 %vm223_vm1, %v3362_v59 }
 0x111   :  { %2653 = vmatmul.mubr.msk.f32.gmra.mrb[14].mxu1 %vm223_vm1, %v3371_v60 }
 0x112   :  { %2711 = vmatprep.mubr.msk.f32.mxu1 %vm93_vm0, %v3228_v23 }
 0x115   :  { %2712 = vmatmul.mubr.msk.f32.vlgmr.msra.gmra.mrb[16].mxu1 %vm93_vm0, %v3226_v21 }
 0x116   :  { %2714 = vmatprep.mubr.msk.f32.mxu1 %vm93_vm0, %v3234_v28 }
 0x119   :  { %2715 = vmatmul.mubr.msk.f32.gmra.mrb[18].mxu1 %vm93_vm0, %v3232_v26 }
 0x11a   :  { %2717 = vmatprep.mubr.msk.f32.mxu1 %vm93_vm0, %v3240_v33 }
 0x11d   :  { %2718 = vmatmul.mubr.msk.f32.gmra.mrb[20].mxu1 %vm93_vm0, %v3238_v31 }
 0x11e   :  { %2720 = vmatprep.mubr.msk.f32.mxu1 %vm93_vm0, %v3252_v40 }
 0x121   :  { %2721 = vmatmul.mubr.msk.f32.gmra.mrb[22].mxu1 %vm93_vm0, %v3244_v36 }
 0x122   :  { %2759 = vmatprep.mubr.msk.f32.mxu1 %vm223_vm1, %v3213_v14 }
 0x1c8   :  { %v3411_v6 = vpop.f32.mrb[0].mxu1 }
 0x1c9   :  { %v338_v7 = vpop.f32.mrb[1].mxu1 }
 0x1cc   :  { %v3419_v10 = vpop.f32.mrb[2].mxu1 }
 0x1cd   :  { %v3421_v12 = vpop.f32.mrb[3].mxu1 }
 0x1d0   :  { %v3423_v13 = vpop.f32.mrb[4].mxu1 }
 0x1d1   :  { %v3425_v14 = vpop.f32.mrb[5].mxu1 }
 0x1d4   :  { %v3427_v15 = vpop.f32.mrb[6].mxu1 }
 0x1d5   :  { %v3429_v17 = vpop.f32.mrb[7].mxu1 }
 0x1d8   :  { %v2645_v19 = vpop.f32.mrb[8].mxu1 }
 0x1d9   :  { %v378_v20 = vpop.f32.mrb[9].mxu1 }
 0x1da   :  { %425 = vrot.lane.b32.xlu0 %v378_v20, %s3131_s21 }
 0x1dc   :  { %v2648_v22 = vpop.f32.mrb[10].mxu1 }
 0x1dd   :  { %v388_v24 = vpop.f32.mrb[11].mxu1 }
 0x1de   :  { %427 = vrot.lane.b32.xlu0 %v2645_v19, %s3131_s21  ;;  %429 = vrot.lane.b32.xlu1 %v388_v24, %s3131_s21  ;;  %v51_v24 = vld [vmem:[%s4146_s3 + $0x18] sm:$0xff] }
 0x1e0   :  { %v2651_v25 = vpop.f32.mrb[12].mxu1 }
 0x1e1   :  { %v398_v27 = vpop.f32.mrb[13].mxu1 }
 0x1e2   :  { %431 = vrot.lane.b32.xlu1 %v2648_v22, %s3131_s21  ;;  %433 = vrot.lane.b32.xlu0 %v398_v27, %s3131_s21  ;;  %v50_v22 = vld [vmem:[%s4146_s3 + $0x10] sm:$0xff]  ;;  %s3133_s3 = smov 96  }
 0x1e3   :  { %v3500_v29 = vpack.c.bf16 %v51_v24, %v50_v22 }
 0x1e4   :  { %v2654_v30 = vpop.f32.mrb[14].mxu1 }
 0x1e5   :  { %v408_v32 = vpop.f32.mrb[15].mxu1 }
 0x1e6   :  { %435 = vrot.lane.b32.xlu1 %v2651_v25, %s3131_s21  ;;  %437 = vrot.lane.b32.xlu0 %v408_v32, %s3131_s21 }
 0x1e8   :  { %v2713_v35 = vpop.f32.mrb[16].mxu1 }
 0x1e9   :  { %v809_v37 = vpop.f32.mrb[17].mxu1  ;;  %v3447_v39 = vadd.f32 %v2713_v35, %v3438_v34 }
 0x1ea   :  { %v3443_v38 = vadd.f32 %v809_v37, %v3438_v34  ;;  %439 = vrot.lane.b32.xlu1 %v2654_v30, %s3131_s21 }
 0x1ec   :  { %v2716_v41 = vpop.f32.mrb[18].mxu1  ;;  %912 = vrot.lane.b32.xlu0 %v3443_v38, %s3132_s22 }
 0x1ed   :  { %v819_v61 = vpop.f32.mrb[19].mxu1  ;;  %v3466_v0 = vadd.f32 %v2716_v41, %v3438_v34 }
 0x1ee   :  { %v3460_v63 = vadd.f32 %v819_v61, %v3438_v34  ;;  %914 = vrot.lane.b32.xlu1 %v3447_v39, %s3132_s22  ;;  %v459_v61 = vsub.s32 1, %v3217_v16 }
 0x1f0   :  { %v2719_v1 = vpop.f32.mrb[20].mxu1  ;;  %916 = vrot.lane.b32.xlu0 %v3460_v63, %s3132_s22 }
 0x1f1   :  { %v829_v2 = vpop.f32.mrb[21].mxu1  ;;  %v3476_v4 = vadd.f32 %v2719_v1, %v3438_v34  ;;  %v460_v1 = vrot.slane %v3223_v18, %v459_v61 }
 0x1f2   :  { %v3471_v3 = vadd.f32 %v829_v2, %v3438_v34  ;;  %918 = vrot.lane.b32.xlu1 %v3466_v0, %s3132_s22 }
 0x1f4   :  { %v2722_v5 = vpop.f32.mrb[22].mxu1  ;;  %920 = vrot.lane.b32.xlu0 %v3471_v3, %s3132_s22 }
 0x1f5   :  { %v839_v8 = vpop.f32.mrb[23].mxu1  ;;  %v3486_v11 = vadd.f32 %v2722_v5, %v3438_v34 }
 0x1f6   :  { %v3481_v9 = vadd.f32 %v839_v8, %v3438_v34  ;;  %922 = vrot.lane.b32.xlu1 %v3476_v4, %s3132_s22 }
 0x1f8   :  { %924 = vrot.lane.b32.xlu0 %v3481_v9, %s3132_s22 }
 0x1fa   :  { %926 = vrot.lane.b32.xlu1 %v3486_v11, %s3132_s22 }
 0x24c   :  { %v426_v19 = vpop.permute.xlu0 %425 }
 0x24d   :  { %v449_v20 = vsel %vm93_vm0, %v338_v7, %v426_v19 }
 0x24e   :  { %2671 = vmatprep.mubr.msk.f32.mxu0 %vm223_vm1, %v449_v20 }
 0x250   :  { %v428_v25 = vpop.permute.xlu0 %427  ;;  %v430_v27 = vpop.permute.xlu1 %429 }
 0x251   :  { %v450_v30 = vsel %vm93_vm0, %v3411_v6, %v428_v25  ;;  %v451_v7 = vsel %vm93_vm0, %v3421_v12, %v430_v27 }
 0x252   :  { %2672 = vmatmul.mubr.msk.f32.vlgmr.msra.gmra.mrb[8].mxu0 %vm223_vm1, %v450_v30 }
 0x253   :  { %2674 = vmatprep.mubr.msk.f32.mxu0 %vm223_vm1, %v451_v7  ;;  %2914 = vmatpush3.bf16.msra.mxu0 %v3457_v62 }
 0x254   :  { %v432_v32 = vpop.permute.xlu1 %431  ;;  %v434_v35 = vpop.permute.xlu0 %433  ;;  %2916 = vmatprep.subr.bf16.mxu0 %v3500_v29 }
 0x255   :  { %v452_v37 = vsel %vm93_vm0, %v3419_v10, %v432_v32  ;;  %v453_v41 = vsel %vm93_vm0, %v3425_v14, %v434_v35 }
 0x256   :  { %2675 = vmatmul.mubr.msk.f32.gmra.mrb[10].mxu0 %vm223_vm1, %v452_v37  ;;  %v59_v37 = vsub.s32 5, %v3217_v16 }
 0x257   :  { %2677 = vmatprep.mubr.msk.f32.mxu0 %vm223_vm1, %v453_v41  ;;  %2918 = vmatpush3.bf16.msra.mxu0 %v3500_v29 }
 0x258   :  { %v436_v6 = vpop.permute.xlu1 %435  ;;  %v438_v12 = vpop.permute.xlu0 %437  ;;  %v3538_v41 = vrot.slane %v3223_v18, %v59_v37 }
 0x259   :  { %v454_v43 = vsel %vm93_vm0, %v3423_v13, %v436_v6  ;;  %v455_v44 = vsel %vm93_vm0, %v3429_v17, %v438_v12 }
 0x25a   :  { %2678 = vmatmul.mubr.msk.f32.gmra.mrb[12].mxu0 %vm223_vm1, %v454_v43 }
 0x25b   :  { %2680 = vmatprep.mubr.msk.f32.mxu0 %vm223_vm1, %v455_v44 }
 0x25c   :  { %v440_v10 = vpop.permute.xlu1 %439 }
 0x25d   :  { %v456_v14 = vsel %vm93_vm0, %v3427_v15, %v440_v10 }
 0x25e   :  { %2681 = vmatmul.mubr.msk.f32.gmra.mrb[14].mxu0 %vm223_vm1, %v456_v14 }
 0x325   :  { %v2673_v2 = vpop.f32.mrb[8].mxu0 }
 0x326   :  { %v551_v5 = vpop.f32.mrb[9].mxu0  ;;  %v557_v8 = vadd.f32 %v2673_v2, %v460_v1 }
 0x327   :  { %v552_v13 = vadd.f32 %v551_v5, %v460_v1 }
 0x329   :  { %v2676_v19 = vpop.f32.mrb[10].mxu0  ;;  %2691 = vmatprep.mubr.msk.f32.mxu0 %vm93_vm0, %v552_v13 }
 0x32a   :  { %v561_v17 = vpop.f32.mrb[11].mxu0  ;;  %2692 = vmatmul.mubr.msk.f32.vlgmr.msra.gmra.mrb[16].mxu0 %vm93_vm0, %v557_v8  ;;  %v567_v22 = vadd.f32 %v2676_v19, %v460_v1 }
 0x32b   :  { %v562_v20 = vadd.f32 %v561_v17, %v460_v1 }
 0x32d   :  { %v2679_v24 = vpop.f32.mrb[12].mxu0  ;;  %2694 = vmatprep.mubr.msk.f32.mxu0 %vm93_vm0, %v562_v20 }
 0x32e   :  { %v571_v15 = vpop.f32.mrb[13].mxu0  ;;  %2695 = vmatmul.mubr.msk.f32.gmra.mrb[18].mxu0 %vm93_vm0, %v567_v22  ;;  %v577_v27 = vadd.f32 %v2679_v24, %v460_v1 }
 0x32f   :  { %v572_v25 = vadd.f32 %v571_v15, %v460_v1 }
 0x331   :  { %v2682_v30 = vpop.f32.mrb[14].mxu0  ;;  %2697 = vmatprep.mubr.msk.f32.mxu0 %vm93_vm0, %v572_v25 }
 0x332   :  { %v581_v7 = vpop.f32.mrb[15].mxu0  ;;  %2698 = vmatmul.mubr.msk.f32.gmra.mrb[20].mxu0 %vm93_vm0, %v577_v27  ;;  %v587_v35 = vadd.f32 %v2682_v30, %v460_v1 }
 0x333   :  { %v582_v32 = vadd.f32 %v581_v7, %v460_v1 }
 0x335   :  { %2700 = vmatprep.mubr.msk.f32.mxu0 %vm93_vm0, %v582_v32 }
 0x336   :  { %2701 = vmatmul.mubr.msk.f32.gmra.mrb[22].mxu0 %vm93_vm0, %v587_v35 }
 0x3fd   :  { %v2693_v6 = vpop.f32.mrb[16].mxu0 }
 0x3fe   :  { %v3541_v12 = vadd.f32 %v2693_v6, %v3538_v41  ;;  %v680_v43 = vpop.f32.mrb[17].mxu0 }
 0x3ff   :  { %v3544_v44 = vadd.f32 %v680_v43, %v3538_v41 }
 0x400   :  { %v849_v10 = vadd.f32 %v3447_v39, %v3541_v12 }
 0x401   :  { %v848_v14 = vadd.f32 %v3443_v38, %v3544_v44  ;;  %v2696_v61 = vpop.f32.mrb[18].mxu0 }
 0x402   :  { %v2360_v1 = vmul.f32 -1.442695, %v849_v10  ;;  %v3551_v2 = vadd.f32 %v2696_v61, %v3538_v41  ;;  %v690_v5 = vpop.f32.mrb[19].mxu0 }
 0x403   :  { %v2359_v13 = vmul.f32 -1.442695, %v848_v14  ;;  %v3554_v8 = vadd.f32 %v690_v5, %v3538_v41 }
 0x404   :  { %3002 = vpow2.f32 %v2360_v1  ;;  %v851_v19 = vadd.f32 %v3466_v0, %v3551_v2 }
 0x405   :  { %3004 = vpow2.f32 %v2359_v13  ;;  %v850_v39 = vadd.f32 %v3460_v63, %v3554_v8  ;;  %v2699_v17 = vpop.f32.mrb[20].mxu0 }
 0x406   :  { %v2362_v38 = vmul.f32 -1.442695, %v851_v19  ;;  %v3561_v20 = vadd.f32 %v2699_v17, %v3538_v41  ;;  %v700_v22 = vpop.f32.mrb[21].mxu0 }
 0x407   :  { %v2361_v24 = vmul.f32 -1.442695, %v850_v39  ;;  %v3564_v15 = vadd.f32 %v700_v22, %v3538_v41  ;;  %v915_v39 = vpop.permute.xlu1 %914 }
 0x408   :  { %3006 = vpow2.f32 %v2362_v38  ;;  %v853_v25 = vadd.f32 %v3476_v4, %v3561_v20  ;;  %v913_v38 = vpop.permute.xlu0 %912 }
 0x409   :  { %3008 = vpow2.f32 %v2361_v24  ;;  %v852_v0 = vadd.f32 %v3471_v3, %v3564_v15  ;;  %v2702_v27 = vpop.f32.mrb[22].mxu0 }
 0x40a   :  { %v2364_v63 = vmul.f32 -1.442695, %v853_v25  ;;  %v3571_v30 = vadd.f32 %v2702_v27, %v3538_v41  ;;  %v710_v7 = vpop.f32.mrb[23].mxu0 }
 0x40b   :  { %v2363_v32 = vmul.f32 -1.442695, %v852_v0  ;;  %v3574_v35 = vadd.f32 %v710_v7, %v3538_v41  ;;  %v919_v0 = vpop.permute.xlu1 %918 }
 0x40c   :  { %3010 = vpow2.f32 %v2364_v63  ;;  %v855_v37 = vadd.f32 %v3486_v11, %v3571_v30 }
 0x40d   :  { %3012 = vpow2.f32 %v2363_v32  ;;  %v854_v4 = vadd.f32 %v3481_v9, %v3574_v35 }
 0x40e   :  { %v3003_v6 = vpop.eup %3002  ;;  %v2366_v3 = vmul.f32 -1.442695, %v855_v37 }
 0x40f   :  { %v3005_v43 = vpop.eup %3004  ;;  %v881_v10 = vadd.f32 1.0, %v3003_v6  ;;  %v2365_v14 = vmul.f32 -1.442695, %v854_v4  ;;  %v917_v4 = vpop.permute.xlu0 %916 }
 0x410   :  { %v880_v61 = vadd.f32 1.0, %v3005_v43  ;;  %3014 = vpow2.f32 %v2366_v3 }
 0x411   :  { %3016 = vrcp.f32 %v881_v10 }
 0x412   :  { %v3007_v1 = vpop.eup %3006  ;;  %3018 = vrcp.f32 %v880_v61 }
 0x413   :  { %v3009_v5 = vpop.eup %3008  ;;  %v883_v13 = vadd.f32 1.0, %v3007_v1  ;;  %3020 = vpow2.f32 %v2365_v14  ;;  %v923_v14 = vpop.permute.xlu1 %922 }
 0x414   :  { %v882_v19 = vadd.f32 1.0, %v3009_v5 }
 0x415   :  { %3022 = vrcp.f32 %v883_v13  ;;  %v921_v13 = vpop.permute.xlu0 %920 }
 0x416   :  { %v3011_v11 = vpop.eup %3010  ;;  %3024 = vrcp.f32 %v882_v19 }
 0x417   :  { %v3013_v17 = vpop.eup %3012  ;;  %v885_v9 = vadd.f32 1.0, %v3011_v11 }
 0x418   :  { %v884_v22 = vadd.f32 1.0, %v3013_v17  ;;  %v927_v17 = vpop.permute.xlu1 %926 }
 0x419   :  { %3026 = vrcp.f32 %v885_v9 }
 0x41a   :  { %v3015_v24 = vpop.eup %3014  ;;  %3028 = vrcp.f32 %v884_v22  ;;  %v925_v22 = vpop.permute.xlu0 %924 }
 0x41b   :  { %v3580_v25 = vpop.eup %3016  ;;  %v887_v27 = vadd.f32 1.0, %v3015_v24 }
 0x41c   :  { %v3582_v63 = vpop.eup %3018  ;;  %v937_v7 = vmul.f32 %v3580_v25, %v915_v39 }
 0x41d   :  { %v3021_v32 = vpop.eup %3020  ;;  %3030 = vrcp.f32 %v887_v27  ;;  %v936_v37 = vmul.f32 %v3582_v63, %v913_v38 }
 0x41e   :  { %v886_v6 = vadd.f32 1.0, %v3021_v32  ;;  %954 = vrot.lane.b32.xlu1 %v937_v7, %s3132_s22 }
 0x41f   :  { %v3587_v3 = vpop.eup %3022  ;;  %952 = vrot.lane.b32.xlu0 %v936_v37, %s3132_s22 }
 0x420   :  { %v3590_v43 = vpop.eup %3024  ;;  %3032 = vrcp.f32 %v886_v6  ;;  %v939_v10 = vmul.f32 %v3587_v3, %v919_v0 }
 0x421   :  { %v938_v61 = vmul.f32 %v3590_v43, %v917_v4 }
 0x422   :  { %958 = vrot.lane.b32.xlu1 %v939_v10, %s3132_s22 }
 0x423   :  { %v3595_v1 = vpop.eup %3026  ;;  %956 = vrot.lane.b32.xlu0 %v938_v61, %s3132_s22 }
 0x424   :  { %v3598_v5 = vpop.eup %3028  ;;  %v941_v19 = vmul.f32 %v3595_v1, %v923_v14 }
 0x425   :  { %v940_v39 = vmul.f32 %v3598_v5, %v921_v13 }
 0x426   :  { %962 = vrot.lane.b32.xlu1 %v941_v19, %s3132_s22 }
 0x427   :  { %v3603_v11 = vpop.eup %3030  ;;  %960 = vrot.lane.b32.xlu0 %v940_v39, %s3132_s22 }
 0x428   :  { %v943_v9 = vmul.f32 %v3603_v11, %v927_v17  ;;  %v34_v17 = vld [vmem:[%s4142_s2 + $0x70] sm:$0xff] }
 0x42a   :  { %v3607_v38 = vpop.eup %3032  ;;  %966 = vrot.lane.b32.xlu1 %v943_v9, %s3132_s22  ;;  %v35_v9 = vld [vmem:[%s4142_s2 + $0x78] sm:$0xff] }
 0x42b   :  { %v942_v24 = vmul.f32 %v3607_v38, %v925_v22  ;;  %v2931_v22 = vpack.c.bf16 %v35_v9, %v34_v17 }
 0x42d   :  { %964 = vrot.lane.b32.xlu0 %v942_v24, %s3132_s22 }
 0x42e   :  { %1040 = vrot.lane.b32.xlu1 %v3228_v23, %s3131_s21 }
 0x432   :  { %1042 = vrot.lane.b32.xlu1 %v3226_v21, %s3131_s21 }
 0x436   :  { %1044 = vrot.lane.b32.xlu1 %v3234_v28, %s3131_s21 }
 0x43a   :  { %1046 = vrot.lane.b32.xlu1 %v3232_v26, %s3131_s21 }
 0x43e   :  { %1048 = vrot.lane.b32.xlu1 %v3240_v33, %s3131_s21 }
 0x442   :  { %1050 = vrot.lane.b32.xlu1 %v3238_v31, %s3131_s21 }
 0x446   :  { %1052 = vrot.lane.b32.xlu1 %v3252_v40, %s3131_s21 }
 0x44a   :  { %1054 = vrot.lane.b32.xlu1 %v3244_v36, %s3131_s21 }
 0x490   :  { %v955_v23 = vpop.permute.xlu1 %954 }
 0x491   :  { %v977_v21 = vadd.f32 %v955_v23, %v3541_v12  ;;  %v953_v0 = vpop.permute.xlu0 %952  ;;  %v993_v23 = vsub.f32 1.0, %v3580_v25 }
 0x492   :  { %v976_v28 = vadd.f32 %v953_v0, %v3544_v44 }
 0x493   :  { %3034 = vtanh.f32 %v977_v21 }
 0x494   :  { %v959_v26 = vpop.permute.xlu1 %958  ;;  %3036 = vtanh.f32 %v976_v28 }
 0x495   :  { %v979_v33 = vadd.f32 %v959_v26, %v3551_v2  ;;  %v957_v27 = vpop.permute.xlu0 %956 }
 0x496   :  { %v978_v31 = vadd.f32 %v957_v27, %v3554_v8  ;;  %v992_v27 = vsub.f32 1.0, %v3582_v63 }
 0x497   :  { %3038 = vtanh.f32 %v979_v33 }
 0x498   :  { %v963_v7 = vpop.permute.xlu1 %962  ;;  %3040 = vtanh.f32 %v978_v31 }
 0x499   :  { %v961_v32 = vpop.permute.xlu0 %960  ;;  %v981_v36 = vadd.f32 %v963_v7, %v3561_v20 }
 0x49a   :  { %v980_v44 = vadd.f32 %v961_v32, %v3564_v15  ;;  %v32_v15 = vld [vmem:[%s4142_s2 + $0x60] sm:$0xff] }
 0x49b   :  { %3042 = vtanh.f32 %v981_v36  ;;  %v995_v36 = vsub.f32 1.0, %v3587_v3 }
 0x49c   :  { %3044 = vtanh.f32 %v980_v44  ;;  %v967_v4 = vpop.permute.xlu1 %966 }
 0x49d   :  { %v3035_v40 = vpop.eup %3034  ;;  %v983_v10 = vadd.f32 %v967_v4, %v3571_v30 }
 0x49e   :  { %1010 = vrot.lane.b32.xlu0 %v3035_v40, %s3133_s3  ;;  %v3037_v12 = vpop.eup %3036 }
 0x49f   :  { %v965_v2 = vpop.permute.xlu0 %964 }
 0x4a0   :  { %v982_v8 = vadd.f32 %v965_v2, %v3574_v35  ;;  %v33_v35 = vld [vmem:[%s4142_s2 + $0x68] sm:$0xff]  ;;  %v1041_v19 = vpop.permute.xlu1 %1040 }
 0x4a1   :  { %v3039_v37 = vpop.eup %3038  ;;  %v2927_v61 = vpack.c.bf16 %v33_v35, %v32_v15  ;;  %v1064_v7 = vmul.f32 %v3582_v63, %v1041_v19  ;;  %v994_v63 = vsub.f32 1.0, %v3590_v43 }
 0x4a2   :  { %1008 = vrot.lane.b32.xlu0 %v3037_v12, %s3133_s3  ;;  %v3041_v6 = vpop.eup %3040  ;;  %3046 = vtanh.f32 %v982_v8 }
 0x4a3   :  { %3048 = vtanh.f32 %v983_v10  ;;  %2928 = vmatprep.subr.bf16.mxu0 %v2927_v61 }
 0x4a4   :  { %2930 = vmatpush3.bf16.msra.mxu0 %v2927_v61  ;;  %v1043_v39 = vpop.permute.xlu1 %1042 }
 0x4a5   :  { %v3043_v20 = vpop.eup %3042  ;;  %2932 = vmatprep.subr.bf16.mxu0 %v2931_v22  ;;  %v1065_v0 = vmul.f32 %v3580_v25, %v1043_v39 }
 0x4a6   :  { %1014 = vrot.lane.b32.xlu0 %v3039_v37, %s3133_s3  ;;  %v3045_v14 = vpop.eup %3044 }
 0x4a8   :  { %2934 = vmatpush3.bf16.msra.mxu0 %v2931_v22  ;;  %v1045_v24 = vpop.permute.xlu1 %1044 }
 0x4a9   :  { %v1066_v4 = vmul.f32 %v3590_v43, %v1045_v24  ;;  %v996_v43 = vsub.f32 1.0, %v3598_v5 }
 0x4aa   :  { %1012 = vrot.lane.b32.xlu0 %v3041_v6, %s3133_s3 }
 0x4ac   :  { %v3047_v13 = vpop.eup %3046  ;;  %v1047_v26 = vpop.permute.xlu1 %1046 }
 0x4ad   :  { %v3049_v30 = vpop.eup %3048  ;;  %v1067_v25 = vmul.f32 %v3587_v3, %v1047_v26  ;;  %v997_v3 = vsub.f32 1.0, %v3595_v1 }
 0x4ae   :  { %1018 = vrot.lane.b32.xlu0 %v3043_v20, %s3133_s3 }
 0x4b0   :  { %v1049_v12 = vpop.permute.xlu1 %1048 }
 0x4b1   :  { %v1068_v19 = vmul.f32 %v3598_v5, %v1049_v12  ;;  %v999_v5 = vsub.f32 1.0, %v3603_v11 }
 0x4b2   :  { %1016 = vrot.lane.b32.xlu0 %v3045_v14, %s3133_s3 }
 0x4b4   :  { %v1051_v10 = vpop.permute.xlu1 %1050 }
 0x4b5   :  { %v1069_v15 = vmul.f32 %v3595_v1, %v1051_v10  ;;  %v998_v1 = vsub.f32 1.0, %v3607_v38 }
 0x4b6   :  { %1020 = vrot.lane.b32.xlu0 %v3047_v13, %s3133_s3 }
 0x4b8   :  { %v1053_v13 = vpop.permute.xlu1 %1052 }
 0x4b9   :  { %v1070_v22 = vmul.f32 %v3607_v38, %v1053_v13 }
 0x4ba   :  { %1022 = vrot.lane.b32.xlu0 %v3049_v30, %s3133_s3 }
 0x510   :  { %v1011_v21 = vpop.permute.xlu0 %1010 }
 0x511   :  { %v1033_v28 = vmul.f32 %v1011_v21, %v993_v23  ;;  %v1055_v23 = vpop.permute.xlu1 %1054 }
 0x513   :  { %v3658_v33 = vadd.f32 %v1065_v0, %v1033_v28  ;;  %v1071_v28 = vmul.f32 %v3603_v11, %v1055_v23 }
 0x514   :  { %v1009_v31 = vpop.permute.xlu0 %1008 }
 0x515   :  { %v1032_v40 = vmul.f32 %v1009_v31, %v992_v27  ;;  %1094 = vrot.lane.b32.xlu1 %v3658_v33, %s3133_s3 }
 0x517   :  { %v3664_v32 = vadd.f32 %v1064_v7, %v1032_v40 }
 0x518   :  { %v1015_v44 = vpop.permute.xlu0 %1014 }
 0x519   :  { %v1035_v2 = vmul.f32 %v1015_v44, %v995_v36  ;;  %1092 = vrot.lane.b32.xlu0 %v3664_v32, %s3133_s3 }
 0x51b   :  { %v3670_v37 = vadd.f32 %v1067_v25, %v1035_v2  ;;  %v1082_v25 = vsub.s32 2, %v3217_v16 }
 0x51c   :  { %v1013_v8 = vpop.permute.xlu0 %1012 }
 0x51d   :  { %v1034_v6 = vmul.f32 %v1013_v8, %v994_v63  ;;  %1098 = vrot.lane.b32.xlu1 %v3670_v37, %s3133_s3  ;;  %v1083_v2 = vrot.slane %v3223_v18, %v1082_v25 }
 0x51f   :  { %v3676_v20 = vadd.f32 %v1066_v4, %v1034_v6 }
 0x520   :  { %v1019_v14 = vpop.permute.xlu0 %1018 }
 0x521   :  { %v1037_v35 = vmul.f32 %v1019_v14, %v997_v3  ;;  %1096 = vrot.lane.b32.xlu0 %v3676_v20, %s3133_s3 }
 0x523   :  { %v3682_v61 = vadd.f32 %v1069_v15, %v1037_v35 }
 0x524   :  { %v1017_v30 = vpop.permute.xlu0 %1016 }
 0x525   :  { %v1036_v39 = vmul.f32 %v1017_v30, %v996_v43  ;;  %1102 = vrot.lane.b32.xlu1 %v3682_v61, %s3133_s3 }
 0x527   :  { %v3688_v17 = vadd.f32 %v1068_v19, %v1036_v39 }
 0x528   :  { %v1021_v9 = vpop.permute.xlu0 %1020 }
 0x529   :  { %v1038_v24 = vmul.f32 %v1021_v9, %v998_v1  ;;  %1100 = vrot.lane.b32.xlu0 %v3688_v17, %s3133_s3 }
 0x52b   :  { %v3694_v21 = vadd.f32 %v1070_v22, %v1038_v24 }
 0x52c   :  { %v1023_v0 = vpop.permute.xlu0 %1022 }
 0x52d   :  { %v1039_v26 = vmul.f32 %v1023_v0, %v999_v5  ;;  %1104 = vrot.lane.b32.xlu0 %v3694_v21, %s3133_s3 }
 0x52f   :  { %v3700_v27 = vadd.f32 %v1071_v28, %v1039_v26 }
 0x531   :  { %1106 = vrot.lane.b32.xlu1 %v3700_v27, %s3133_s3 }
 0x587   :  { %v3706_v31 = vpop.permute.xlu1 %1094 }
 0x58b   :  { %v3704_v38 = vpop.permute.xlu0 %1092 }
 0x58c   :  { %2731 = vmatprep.mubr.msk.f32.mxu0 %vm93_vm0, %v3704_v38 }
 0x58d   :  { %2732 = vmatmul.mubr.msk.f32.vlgmr.msra.gmra.mrb[24].mxu0 %vm93_vm0, %v3706_v31 }
 0x58f   :  { %v3714_v7 = vpop.permute.xlu1 %1098 }
 0x593   :  { %v3712_v11 = vpop.permute.xlu0 %1096 }
 0x594   :  { %2734 = vmatprep.mubr.msk.f32.mxu0 %vm93_vm0, %v3712_v11 }
 0x595   :  { %2735 = vmatmul.mubr.msk.f32.gmra.mrb[26].mxu0 %vm93_vm0, %v3714_v7 }
 0x597   :  { %v1103_v36 = vpop.permute.xlu1 %1102 }
 0x59b   :  { %v1101_v40 = vpop.permute.xlu0 %1100 }
 0x59c   :  { %2737 = vmatprep.mubr.msk.f32.mxu0 %vm93_vm0, %v1101_v40 }
 0x59d   :  { %2738 = vmatmul.mubr.msk.f32.gmra.mrb[28].mxu0 %vm93_vm0, %v1103_v36 }
 0x59f   :  { %v1105_v12 = vpop.permute.xlu0 %1104 }
 0x5a0   :  { %2740 = vmatprep.mubr.msk.f32.mxu0 %vm93_vm0, %v1105_v12 }
 0x5a3   :  { %v1107_v44 = vpop.permute.xlu1 %1106 }
 0x5a4   :  { %2741 = vmatmul.mubr.msk.f32.gmra.mrb[30].mxu0 %vm93_vm0, %v1107_v44 }
 0x660   :  { %v2733_v63 = vpop.f32.mrb[24].mxu0 }
 0x661   :  { %v1196_v8 = vadd.f32 %v2733_v63, %v1083_v2  ;;  %v1190_v4 = vpop.f32.mrb[25].mxu0 }
 0x662   :  { %v1191_v6 = vadd.f32 %v1190_v4, %v1083_v2 }
 0x664   :  { %v2935_v10 = vpack.c.bf16 %v1196_v8, %v1191_v6 }
 0x666   :  { %2936 = vmatprep.subr.bf16.mxu1 %v2935_v10 }
 0x667   :  { %2938 = vmatpush3.bf16.msra.mxu1 %v2935_v10 }
 0x668   :  { %v2736_v3 = vpop.f32.mrb[26].mxu0 }
 0x669   :  { %v1206_v14 = vadd.f32 %v2736_v3, %v1083_v2  ;;  %v1200_v15 = vpop.f32.mrb[27].mxu0 }
 0x66a   :  { %v1201_v35 = vadd.f32 %v1200_v15, %v1083_v2 }
 0x66c   :  { %v2939_v43 = vpack.c.bf16 %v1206_v14, %v1201_v35 }
 0x66e   :  { %2940 = vmatprep.subr.bf16.mxu1 %v2939_v43 }
 0x66f   :  { %2942 = vmatpush3.bf16.msra.mxu1 %v2939_v43 }
 0x670   :  { %v2739_v13 = vpop.f32.mrb[28].mxu0 }
 0x671   :  { %v1216_v30 = vadd.f32 %v2739_v13, %v1083_v2  ;;  %v1210_v19 = vpop.f32.mrb[29].mxu0 }
 0x672   :  { %v1211_v39 = vadd.f32 %v1210_v19, %v1083_v2 }
 0x674   :  { %v2943_v1 = vpack.c.bf16 %v1216_v30, %v1211_v39 }
 0x676   :  { %2944 = vmatprep.subr.bf16.mxu1 %v2943_v1 }
 0x677   :  { %v2742_v18 = vpop.f32.mrb[30].mxu0  ;;  %2946 = vmatpush3.bf16.msra.mxu1 %v2943_v1 }
 0x678   :  { %v1226_v9 = vadd.f32 %v2742_v18, %v1083_v2  ;;  %v1220_v22 = vpop.f32.mrb[31].mxu0 }
 0x679   :  { %v1221_v24 = vadd.f32 %v1220_v22, %v1083_v2 }
 0x67b   :  { %v2947_v23 = vpack.c.bf16 %v1226_v9, %v1221_v24 }
 0x67d   :  { %2948 = vmatprep.subr.bf16.mxu1 %v2947_v23 }
 0x67e   :  { %2950 = vmatpush3.bf16.msra.mxu1 %v2947_v23 }
 0x67f   :  { %2976 = vmatprep.subr.bf16.mxu1 %v3256_v42 }
 0x681   :  { %2760 = vmatmul.mubr.msk.f32.vlgmr.msra.gmra.mrb[24].mxu1 %vm223_vm1, %v3267_v45  ;;  %v37_v45 = vld [vmem:[%s4142_s2 + $0x88] sm:$0xff] }
 0x682   :  { %2762 = vmatprep.mubr.msk.f32.mxu1 %vm223_vm1, %v3272_v46  ;;  %2978 = vmatpush3.bf16.msra.mxu1 %v3256_v42  ;;  %v36_v42 = vld [vmem:[%s4142_s2 + $0x80] sm:$0xff]  ;;  %v38_v46 = vld [vmem:[%s4142_s2 + $0x90] sm:$0xff] }
 0x683   :  { %2980 = vmatprep.subr.bf16.mxu1 %v3275_v47 }
 0x685   :  { %2763 = vmatmul.mubr.msk.f32.gmra.mrb[26].mxu1 %vm223_vm1, %v3284_v48  ;;  %v39_v48 = vld [vmem:[%s4142_s2 + $0x98] sm:$0xff] }
 0x686   :  { %2765 = vmatprep.mubr.msk.f32.mxu1 %vm223_vm1, %v3290_v49  ;;  %2982 = vmatpush3.bf16.msra.mxu1 %v3275_v47  ;;  %v2951_v47 = vpack.c.bf16 %v37_v45, %v36_v42  ;;  %v2955_v49 = vpack.c.bf16 %v39_v48, %v38_v46 }
 0x688   :  { %2952 = vmatprep.subr.bf16.mxu0 %v2951_v47 }
 0x689   :  { %2766 = vmatmul.mubr.msk.f32.gmra.mrb[28].mxu1 %vm223_vm1, %v3300_v50  ;;  %v40_v50 = vld [vmem:[%s4142_s2 + $0xa0] sm:$0xff]  ;;  %2954 = vmatpush3.bf16.msra.mxu0 %v2951_v47 }
 0x68a   :  { %2768 = vmatprep.mubr.msk.f32.mxu1 %vm223_vm1, %v3306_v51  ;;  %v41_v51 = vld [vmem:[%s4142_s2 + $0xa8] sm:$0xff]  ;;  %2956 = vmatprep.subr.bf16.mxu0 %v2955_v49 }
 0x68d   :  { %2769 = vmatmul.mubr.msk.f32.gmra.mrb[30].mxu1 %vm223_vm1, %v3315_v52  ;;  %v2959_v52 = vpack.c.bf16 %v41_v51, %v40_v50  ;;  %2958 = vmatpush3.bf16.msra.mxu0 %v2955_v49  ;;  %v3877_v51 = vld [vmem:[%s4145_s4] sm:$0xff] }
 0x68e   :  { %2771 = vmatprep.mubr.msk.f32.mxu1 %vm223_vm1, %v3320_v53  ;;  %v42_v53 = vld [vmem:[%s4142_s2 + $0xb0] sm:$0xff] }
 0x68f   :  { %2960 = vmatprep.subr.bf16.mxu0 %v2959_v52 }
 0x691   :  { %2772 = vmatmul.mubr.msk.f32.gmra.mrb[32].mxu1 %vm223_vm1, %v3329_v54  ;;  %v43_v54 = vld [vmem:[%s4142_s2 + $0xb8] sm:$0xff]  ;;  %2962 = vmatpush3.bf16.msra.mxu0 %v2959_v52 }
 0x692   :  { %2774 = vmatprep.mubr.msk.f32.mxu1 %vm223_vm1, %v3334_v55  ;;  %v2963_v55 = vpack.c.bf16 %v43_v54, %v42_v53 }
 0x694   :  { %2964 = vmatprep.subr.bf16.mxu0 %v2963_v55 }
 0x695   :  { %2775 = vmatmul.mubr.msk.f32.gmra.mrb[34].mxu1 %vm223_vm1, %v3343_v56  ;;  %2966 = vmatpush3.bf16.msra.mxu0 %v2963_v55 }
 0x696   :  { %2777 = vmatprep.mubr.msk.f32.mxu1 %vm223_vm1, %v3348_v57  ;;  %2968 = vmatprep.subr.bf16.mxu0 %v3457_v62 }
 0x699   :  { %2778 = vmatmul.mubr.msk.f32.gmra.mrb[36].mxu1 %vm223_vm1, %v3357_v58 }
 0x69a   :  { %2780 = vmatprep.mubr.msk.f32.mxu1 %vm223_vm1, %v3362_v59 }
 0x69d   :  { %2781 = vmatmul.mubr.msk.f32.gmra.mrb[38].mxu1 %vm223_vm1, %v3371_v60 }
 0x69e   :  { %2839 = vmatprep.mubr.msk.f32.mxu1 %vm93_vm0, %v3704_v38 }
 0x6a1   :  { %2840 = vmatmul.mubr.msk.f32.vlgmr.msra.gmra.mrb[40].mxu1 %vm93_vm0, %v3706_v31 }
 0x6a2   :  { %2842 = vmatprep.mubr.msk.f32.mxu1 %vm93_vm0, %v3712_v11 }
 0x6a5   :  { %2843 = vmatmul.mubr.msk.f32.gmra.mrb[42].mxu1 %vm93_vm0, %v3714_v7 }
 0x6a6   :  { %2845 = vmatprep.mubr.msk.f32.mxu1 %vm93_vm0, %v1101_v40 }
 0x6a9   :  { %2846 = vmatmul.mubr.msk.f32.gmra.mrb[44].mxu1 %vm93_vm0, %v1103_v36 }
 0x6aa   :  { %2848 = vmatprep.mubr.msk.f32.mxu1 %vm93_vm0, %v1105_v12 }
 0x6ad   :  { %2849 = vmatmul.mubr.msk.f32.gmra.mrb[46].mxu1 %vm93_vm0, %v1107_v44 }
 0x754   :  { %v2761_v56 = vpop.f32.mrb[24].mxu1 }
 0x755   :  { %v1295_v57 = vpop.f32.mrb[25].mxu1 }
 0x758   :  { %v2764_v58 = vpop.f32.mrb[26].mxu1 }
 0x759   :  { %v1305_v59 = vpop.f32.mrb[27].mxu1 }
 0x75c   :  { %v3797_v60 = vpop.f32.mrb[28].mxu1 }
 0x75d   :  { %v1315_v5 = vpop.f32.mrb[29].mxu1 }
 0x760   :  { %v3799_v0 = vpop.f32.mrb[30].mxu1 }
 0x761   :  { %v3801_v28 = vpop.f32.mrb[31].mxu1 }
 0x764   :  { %v2773_v26 = vpop.f32.mrb[32].mxu1 }
 0x765   :  { %1384 = vrot.lane.b32.xlu1 %v2773_v26, %s3131_s21  ;;  %v1335_v38 = vpop.f32.mrb[33].mxu1 }
 0x766   :  { %1382 = vrot.lane.b32.xlu0 %v1335_v38, %s3131_s21 }
 0x768   :  { %v2776_v31 = vpop.f32.mrb[34].mxu1 }
 0x769   :  { %1388 = vrot.lane.b32.xlu1 %v2776_v31, %s3131_s21  ;;  %v1345_v11 = vpop.f32.mrb[35].mxu1 }
 0x76a   :  { %1386 = vrot.lane.b32.xlu0 %v1345_v11, %s3131_s21 }
 0x76c   :  { %v2779_v7 = vpop.f32.mrb[36].mxu1 }
 0x76d   :  { %1392 = vrot.lane.b32.xlu1 %v2779_v7, %s3131_s21  ;;  %v1355_v40 = vpop.f32.mrb[37].mxu1 }
 0x76e   :  { %1390 = vrot.lane.b32.xlu0 %v1355_v40, %s3131_s21 }
 0x770   :  { %v2782_v36 = vpop.f32.mrb[38].mxu1 }
 0x771   :  { %1396 = vrot.lane.b32.xlu1 %v2782_v36, %s3131_s21  ;;  %v1365_v12 = vpop.f32.mrb[39].mxu1 }
 0x772   :  { %1394 = vrot.lane.b32.xlu0 %v1365_v12, %s3131_s21 }
 0x774   :  { %v2841_v44 = vpop.f32.mrb[40].mxu1 }
 0x775   :  { %v3812_v25 = vadd.f32 %v2841_v44, %v3438_v34  ;;  %v1742_v2 = vpop.f32.mrb[41].mxu1 }
 0x776   :  { %v3815_v63 = vadd.f32 %v1742_v2, %v3438_v34 }
 0x777   :  { %1847 = vrot.lane.b32.xlu1 %v3812_v25, %s3132_s22 }
 0x778   :  { %v2844_v8 = vpop.f32.mrb[42].mxu1  ;;  %1845 = vrot.lane.b32.xlu0 %v3815_v63, %s3132_s22 }
 0x779   :  { %v3822_v4 = vadd.f32 %v2844_v8, %v3438_v34  ;;  %v1752_v6 = vpop.f32.mrb[43].mxu1 }
 0x77a   :  { %v3825_v10 = vadd.f32 %v1752_v6, %v3438_v34 }
 0x77b   :  { %1851 = vrot.lane.b32.xlu1 %v3822_v4, %s3132_s22 }
 0x77c   :  { %v2847_v3 = vpop.f32.mrb[44].mxu1  ;;  %1849 = vrot.lane.b32.xlu0 %v3825_v10, %s3132_s22 }
 0x77d   :  { %v1762_v14 = vpop.f32.mrb[45].mxu1  ;;  %v3837_v13 = vadd.f32 %v2847_v3, %v3438_v34 }
 0x77e   :  { %v3832_v15 = vadd.f32 %v1762_v14, %v3438_v34 }
 0x780   :  { %v2850_v35 = vpop.f32.mrb[46].mxu1  ;;  %1853 = vrot.lane.b32.xlu0 %v3832_v15, %s3132_s22 }
 0x781   :  { %v1772_v43 = vpop.f32.mrb[47].mxu1  ;;  %v3847_v19 = vadd.f32 %v2850_v35, %v3438_v34 }
 0x782   :  { %v3840_v30 = vadd.f32 %v1772_v43, %v3438_v34 }
 0x784   :  { %1857 = vrot.lane.b32.xlu1 %v3840_v30, %s3132_s22  ;;  %1855 = vrot.lane.b32.xlu0 %v3837_v13, %s3132_s22 }
 0x788   :  { %1859 = vrot.lane.b32.xlu1 %v3847_v19, %s3132_s22 }
 0x7d7   :  { %v1385_v39 = vpop.permute.xlu1 %1384 }
 0x7d8   :  { %v1383_v1 = vpop.permute.xlu0 %1382  ;;  %v1407_v9 = vsel %vm93_vm0, %v2761_v56, %v1385_v39 }
 0x7d9   :  { %v1406_v18 = vsel %vm93_vm0, %v1295_v57, %v1383_v1 }
 0x7da   :  { %2799 = vmatprep.mubr.msk.f32.mxu0 %vm223_vm1, %v1406_v18 }
 0x7db   :  { %2800 = vmatmul.mubr.msk.f32.vlgmr.msra.gmra.mrb[32].mxu0 %vm223_vm1, %v1407_v9  ;;  %v1389_v22 = vpop.permute.xlu1 %1388 }
 0x7dc   :  { %v1387_v24 = vpop.permute.xlu0 %1386  ;;  %2970 = vmatpush3.bf16.msra.mxu0 %v3457_v62  ;;  %v1409_v23 = vsel %vm93_vm0, %v2764_v58, %v1389_v22 }
 0x7dd   :  { %v1408_v34 = vsel %vm93_vm0, %v1305_v59, %v1387_v24  ;;  %2972 = vmatprep.subr.bf16.mxu0 %v3500_v29 }
 0x7de   :  { %2802 = vmatprep.mubr.msk.f32.mxu0 %vm223_vm1, %v1408_v34 }
 0x7df   :  { %2803 = vmatmul.mubr.msk.f32.gmra.mrb[34].mxu0 %vm223_vm1, %v1409_v23  ;;  %v1393_v42 = vpop.permute.xlu1 %1392 }
 0x7e0   :  { %v1391_v45 = vpop.permute.xlu0 %1390  ;;  %2974 = vmatpush3.bf16.msra.mxu0 %v3500_v29  ;;  %v1411_v47 = vsel %vm93_vm0, %v3797_v60, %v1393_v42  ;;  %v1416_v29 = vsub.s32 3, %v3217_v16 }
 0x7e1   :  { %v1410_v46 = vsel %vm93_vm0, %v1315_v5, %v1391_v45 }
 0x7e2   :  { %2805 = vmatprep.mubr.msk.f32.mxu0 %vm223_vm1, %v1410_v46  ;;  %v1417_v52 = vrot.slane %v3877_v51, %v1416_v29 }
 0x7e3   :  { %2806 = vmatmul.mubr.msk.f32.gmra.mrb[36].mxu0 %vm223_vm1, %v1411_v47  ;;  %v1397_v62 = vpop.permute.xlu1 %1396 }
 0x7e4   :  { %v1395_v48 = vpop.permute.xlu0 %1394  ;;  %v1413_v50 = vsel %vm93_vm0, %v3799_v0, %v1397_v62 }
 0x7e5   :  { %v1412_v49 = vsel %vm93_vm0, %v3801_v28, %v1395_v48 }
 0x7e6   :  { %2808 = vmatprep.mubr.msk.f32.mxu0 %vm223_vm1, %v1412_v49 }
 0x7e7   :  { %2809 = vmatmul.mubr.msk.f32.gmra.mrb[38].mxu0 %vm223_vm1, %v1413_v50 }
 0x8ae   :  { %v2801_v53 = vpop.f32.mrb[32].mxu0 }
 0x8af   :  { %v1508_v54 = vpop.f32.mrb[33].mxu0  ;;  %v1514_v56 = vadd.f32 %v2801_v53, %v1417_v52 }
 0x8b0   :  { %v1509_v55 = vadd.f32 %v1508_v54, %v1417_v52 }
 0x8b2   :  { %v2804_v57 = vpop.f32.mrb[34].mxu0  ;;  %2819 = vmatprep.mubr.msk.f32.mxu0 %vm93_vm0, %v1509_v55 }
 0x8b3   :  { %v1518_v58 = vpop.f32.mrb[35].mxu0  ;;  %2820 = vmatmul.mubr.msk.f32.vlgmr.msra.gmra.mrb[40].mxu0 %vm93_vm0, %v1514_v56  ;;  %v1524_v60 = vadd.f32 %v2804_v57, %v1417_v52  ;;  %v1846_v57 = vpop.permute.xlu0 %1845 }
 0x8b4   :  { %v1519_v59 = vadd.f32 %v1518_v58, %v1417_v52 }
 0x8b6   :  { %v2807_v5 = vpop.f32.mrb[36].mxu0  ;;  %2822 = vmatprep.mubr.msk.f32.mxu0 %vm93_vm0, %v1519_v59 }
 0x8b7   :  { %v1528_v0 = vpop.f32.mrb[37].mxu0  ;;  %2823 = vmatmul.mubr.msk.f32.gmra.mrb[42].mxu0 %vm93_vm0, %v1524_v60  ;;  %v1534_v26 = vadd.f32 %v2807_v5, %v1417_v52  ;;  %v1848_v60 = vpop.permute.xlu1 %1847 }
 0x8b8   :  { %v1529_v28 = vadd.f32 %v1528_v0, %v1417_v52 }
 0x8ba   :  { %v2810_v38 = vpop.f32.mrb[38].mxu0  ;;  %2825 = vmatprep.mubr.msk.f32.mxu0 %vm93_vm0, %v1529_v28 }
 0x8bb   :  { %v1538_v31 = vpop.f32.mrb[39].mxu0  ;;  %2826 = vmatmul.mubr.msk.f32.gmra.mrb[44].mxu0 %vm93_vm0, %v1534_v26  ;;  %v1544_v7 = vadd.f32 %v2810_v38, %v1417_v52  ;;  %v1850_v26 = vpop.permute.xlu0 %1849 }
 0x8bc   :  { %v1539_v11 = vadd.f32 %v1538_v31, %v1417_v52 }
 0x8be   :  { %2828 = vmatprep.mubr.msk.f32.mxu0 %vm93_vm0, %v1539_v11 }
 0x8bf   :  { %2829 = vmatmul.mubr.msk.f32.gmra.mrb[46].mxu0 %vm93_vm0, %v1544_v7 }
 0x986   :  { %v2821_v40 = vpop.f32.mrb[40].mxu0 }
 0x987   :  { %v3889_v36 = vadd.f32 %v2821_v40, %v3538_v41  ;;  %v1637_v12 = vpop.f32.mrb[41].mxu0 }
 0x988   :  { %v3892_v44 = vadd.f32 %v1637_v12, %v3538_v41 }
 0x989   :  { %v1782_v2 = vadd.f32 %v3812_v25, %v3889_v36 }
 0x98a   :  { %v1781_v8 = vadd.f32 %v3815_v63, %v3892_v44  ;;  %v2824_v6 = vpop.f32.mrb[42].mxu0 }
 0x98b   :  { %v2416_v3 = vmul.f32 -1.442695, %v1782_v2  ;;  %v3899_v14 = vadd.f32 %v2824_v6, %v3538_v41  ;;  %v1647_v35 = vpop.f32.mrb[43].mxu0  ;;  %v1852_v2 = vpop.permute.xlu1 %1851 }
 0x98c   :  { %v2415_v43 = vmul.f32 -1.442695, %v1781_v8  ;;  %v3902_v39 = vadd.f32 %v1647_v35, %v3538_v41  ;;  %v1854_v35 = vpop.permute.xlu0 %1853 }
 0x98d   :  { %3050 = vpow2.f32 %v2416_v3  ;;  %v1784_v1 = vadd.f32 %v3822_v4, %v3899_v14 }
 0x98e   :  { %3052 = vpow2.f32 %v2415_v43  ;;  %v1783_v25 = vadd.f32 %v3825_v10, %v3902_v39  ;;  %v2827_v18 = vpop.f32.mrb[44].mxu0 }
 0x98f   :  { %v2418_v63 = vmul.f32 -1.442695, %v1784_v1  ;;  %v3909_v9 = vadd.f32 %v2827_v18, %v3538_v41  ;;  %v1657_v22 = vpop.f32.mrb[45].mxu0  ;;  %v1858_v18 = vpop.permute.xlu1 %1857 }
 0x990   :  { %v2417_v24 = vmul.f32 -1.442695, %v1783_v25  ;;  %v3912_v34 = vadd.f32 %v1657_v22, %v3538_v41 }
 0x991   :  { %3054 = vpow2.f32 %v2418_v63  ;;  %v1786_v23 = vadd.f32 %v3837_v13, %v3909_v9  ;;  %v1856_v63 = vpop.permute.xlu0 %1855 }
 0x992   :  { %3056 = vpow2.f32 %v2417_v24  ;;  %v1785_v4 = vadd.f32 %v3832_v15, %v3912_v34  ;;  %v2830_v42 = vpop.f32.mrb[46].mxu0 }
 0x993   :  { %v2420_v10 = vmul.f32 -1.442695, %v1786_v23  ;;  %v3919_v45 = vadd.f32 %v2830_v42, %v3538_v41  ;;  %v1667_v46 = vpop.f32.mrb[47].mxu0  ;;  %v1860_v42 = vpop.permute.xlu1 %1859 }
 0x994   :  { %v2419_v47 = vmul.f32 -1.442695, %v1785_v4  ;;  %v3922_v62 = vadd.f32 %v1667_v46, %v3538_v41 }
 0x995   :  { %3058 = vpow2.f32 %v2420_v10  ;;  %v1788_v48 = vadd.f32 %v3847_v19, %v3919_v45 }
 0x996   :  { %3060 = vpow2.f32 %v2419_v47  ;;  %v1787_v13 = vadd.f32 %v3840_v30, %v3922_v62 }
 0x997   :  { %v3051_v49 = vpop.eup %3050  ;;  %v2422_v15 = vmul.f32 -1.442695, %v1788_v48 }
 0x998   :  { %v3053_v50 = vpop.eup %3052  ;;  %v1814_v29 = vadd.f32 1.0, %v3051_v49  ;;  %v2421_v52 = vmul.f32 -1.442695, %v1787_v13 }
 0x999   :  { %v1813_v53 = vadd.f32 1.0, %v3053_v50  ;;  %3062 = vpow2.f32 %v2422_v15 }
 0x99a   :  { %3064 = vrcp.f32 %v1814_v29 }
 0x99b   :  { %v3055_v54 = vpop.eup %3054  ;;  %3066 = vrcp.f32 %v1813_v53 }
 0x99c   :  { %v3057_v41 = vpop.eup %3056  ;;  %v1816_v55 = vadd.f32 1.0, %v3055_v54  ;;  %3068 = vpow2.f32 %v2421_v52 }
 0x99d   :  { %v1815_v56 = vadd.f32 1.0, %v3057_v41 }
 0x99e   :  { %3070 = vrcp.f32 %v1816_v55 }
 0x99f   :  { %v3059_v19 = vpop.eup %3058  ;;  %3072 = vrcp.f32 %v1815_v56 }
 0x9a0   :  { %v3061_v58 = vpop.eup %3060  ;;  %v1818_v30 = vadd.f32 1.0, %v3059_v19 }
 0x9a1   :  { %v1817_v59 = vadd.f32 1.0, %v3061_v58  ;;  %v46_v58 = vld [vmem:[%s4142_s2 + $0xd0] sm:$0xff] }
 0x9a3   :  { %v3063_v5 = vpop.eup %3062  ;;  %3074 = vrcp.f32 %v1817_v59 }
 0x9a4   :  { %v3928_v0 = vpop.eup %3064  ;;  %3076 = vrcp.f32 %v1818_v30  ;;  %v1820_v7 = vadd.f32 1.0, %v3063_v5 }
 0x9a5   :  { %v3930_v28 = vpop.eup %3066  ;;  %v1870_v38 = vmul.f32 %v3928_v0, %v1848_v60 }
 0x9a6   :  { %v3069_v31 = vpop.eup %3068  ;;  %v1869_v11 = vmul.f32 %v3930_v28, %v1846_v57 }
 0x9a7   :  { %v1819_v40 = vadd.f32 1.0, %v3069_v31  ;;  %1887 = vrot.lane.b32.xlu1 %v1870_v38, %s3132_s22  ;;  %v1926_v38 = vsub.f32 1.0, %v3928_v0 }
 0x9a8   :  { %v3935_v12 = vpop.eup %3070  ;;  %1885 = vrot.lane.b32.xlu0 %v1869_v11, %s3132_s22  ;;  %v1925_v11 = vsub.f32 1.0, %v3930_v28 }
 0x9a9   :  { %v3938_v8 = vpop.eup %3072  ;;  %3078 = vrcp.f32 %v1819_v40  ;;  %v1872_v6 = vmul.f32 %v3935_v12, %v1852_v2 }
 0x9aa   :  { %v1871_v3 = vmul.f32 %v3938_v8, %v1850_v26  ;;  %3080 = vrcp.f32 %v1820_v7  ;;  %v1974_v7 = vmul.f32 %v3928_v0, %v3658_v33  ;;  %v1975_v0 = vmul.f32 %v3938_v8, %v3676_v20 }
 0x9ab   :  { %1891 = vrot.lane.b32.xlu1 %v1872_v6, %s3132_s22  ;;  %v1973_v6 = vmul.f32 %v3930_v28, %v3664_v32 }
 0x9ac   :  { %1889 = vrot.lane.b32.xlu0 %v1871_v3, %s3132_s22 }
 0x9ad   :  { %v3944_v43 = vpop.eup %3074 }
 0x9ae   :  { %v1873_v1 = vmul.f32 %v3944_v43, %v1854_v35  ;;  %v3947_v25 = vpop.eup %3076 }
 0x9af   :  { %v1874_v22 = vmul.f32 %v3947_v25, %v1856_v63 }
 0x9b0   :  { %1893 = vrot.lane.b32.xlu0 %v1873_v1, %s3132_s22  ;;  %v1928_v1 = vsub.f32 1.0, %v3935_v12 }
 0x9b3   :  { %v3951_v24 = vpop.eup %3078 }
 0x9b4   :  { %v1875_v23 = vmul.f32 %v3951_v24, %v1858_v18  ;;  %1895 = vrot.lane.b32.xlu0 %v1874_v22, %s3132_s22  ;;  %v3955_v4 = vpop.eup %3080  ;;  %v1927_v22 = vsub.f32 1.0, %v3938_v8  ;;  %v1931_v8 = vsub.f32 1.0, %v3951_v24 }
 0x9b5   :  { %v1876_v10 = vmul.f32 %v3955_v4, %v1860_v42 }
 0x9b6   :  { %1897 = vrot.lane.b32.xlu1 %v1875_v23, %s3132_s22  ;;  %v1976_v23 = vmul.f32 %v3935_v12, %v3670_v37  ;;  %v1977_v37 = vmul.f32 %v3944_v43, %v3688_v17 }
 0x9ba   :  { %1899 = vrot.lane.b32.xlu1 %v1876_v10, %s3132_s22 }
 0xa19   :  { %v1888_v46 = vpop.permute.xlu1 %1887 }
 0xa1a   :  { %v1910_v47 = vadd.f32 %v1888_v46, %v3889_v36  ;;  %v1886_v48 = vpop.permute.xlu0 %1885  ;;  %v1929_v46 = vsub.f32 1.0, %v3944_v43 }
 0xa1b   :  { %v1909_v13 = vadd.f32 %v1886_v48, %v3892_v44 }
 0xa1c   :  { %3082 = vtanh.f32 %v1910_v47 }
 0xa1d   :  { %3084 = vtanh.f32 %v1909_v13  ;;  %v1892_v49 = vpop.permute.xlu1 %1891  ;;  %v1930_v13 = vsub.f32 1.0, %v3947_v25 }
 0xa1e   :  { %v1912_v15 = vadd.f32 %v1892_v49, %v3899_v14  ;;  %v1890_v50 = vpop.permute.xlu0 %1889  ;;  %v1978_v49 = vmul.f32 %v3947_v25, %v3682_v61 }
 0xa1f   :  { %v1911_v29 = vadd.f32 %v1890_v50, %v3902_v39 }
 0xa20   :  { %3086 = vtanh.f32 %v1912_v15 }
 0xa21   :  { %3088 = vtanh.f32 %v1911_v29  ;;  %v1979_v29 = vmul.f32 %v3951_v24, %v3694_v21 }
 0xa22   :  { %v1894_v52 = vpop.permute.xlu0 %1893 }
 0xa23   :  { %v1913_v53 = vadd.f32 %v1894_v52, %v3912_v34 }
 0xa25   :  { %3090 = vtanh.f32 %v1913_v53  ;;  %v1932_v53 = vsub.f32 1.0, %v3955_v4 }
 0xa26   :  { %v3083_v54 = vpop.eup %3082  ;;  %v1896_v41 = vpop.permute.xlu0 %1895 }
 0xa27   :  { %v3085_v36 = vpop.eup %3084  ;;  %v1914_v55 = vadd.f32 %v1896_v41, %v3909_v9  ;;  %1943 = vrot.lane.b32.xlu1 %v3083_v54, %s3133_s3  ;;  %v44_v9 = vld [vmem:[%s4142_s2 + $0xc0] sm:$0xff]  ;;  %v1980_v41 = vmul.f32 %v3955_v4, %v3700_v27 }
 0xa28   :  { %v1898_v44 = vpop.permute.xlu1 %1897  ;;  %1941 = vrot.lane.b32.xlu0 %v3085_v36, %s3133_s3 }
 0xa29   :  { %v1915_v14 = vadd.f32 %v1898_v44, %v3922_v62  ;;  %3092 = vtanh.f32 %v1914_v55  ;;  %v45_v62 = vld [vmem:[%s4142_s2 + $0xc8] sm:$0xff] }
 0xa2a   :  { %v3087_v39 = vpop.eup %3086  ;;  %v2983_v30 = vpack.c.bf16 %v45_v62, %v44_v9 }
 0xa2b   :  { %v3089_v56 = vpop.eup %3088  ;;  %3094 = vtanh.f32 %v1915_v14  ;;  %1947 = vrot.lane.b32.xlu1 %v3087_v39, %s3133_s3  ;;  %v1991_v39 = vsub.s32 4, %v3217_v16 }
 0xa2c   :  { %v1900_v34 = vpop.permute.xlu1 %1899  ;;  %1945 = vrot.lane.b32.xlu0 %v3089_v56, %s3133_s3  ;;  %2984 = vmatprep.subr.bf16.mxu0 %v2983_v30 }
 0xa2d   :  { %v1916_v19 = vadd.f32 %v1900_v34, %v3919_v45  ;;  %v47_v45 = vld [vmem:[%s4142_s2 + $0xd8] sm:$0xff]  ;;  %2986 = vmatpush3.bf16.msra.mxu0 %v2983_v30  ;;  %2991 = vmatprep.subr.bf16.mxu1 %v2983_v30  ;;  %v1992_v56 = vrot.slane %v3877_v51, %v1991_v39  ;;  %s3134_s2 = smov 127  }
 0xa2e   :  { %v2987_v60 = vpack.c.bf16 %v47_v45, %v46_v58  ;;  %2993 = vmatpush3.bf16.msra.mxu1 %v2983_v30 }
 0xa2f   :  { %v3091_v57 = vpop.eup %3090  ;;  %3096 = vtanh.f32 %v1916_v19 }
 0xa30   :  { %1949 = vrot.lane.b32.xlu0 %v3091_v57, %s3133_s3  ;;  %2988 = vmatprep.subr.bf16.mxu0 %v2987_v60 }
 0xa31   :  { %2992 = vmatprep.subr.bf16.mxu1 %v2987_v60  ;;  %2990 = vmatpush3.bf16.msra.mxu0 %v2987_v60 }
 0xa32   :  { %2994 = vmatpush3.bf16.msra.mxu1 %v2987_v60 }
 0xa33   :  { %v3093_v59 = vpop.eup %3092 }
 0xa34   :  { %1951 = vrot.lane.b32.xlu0 %v3093_v59, %s3133_s3 }
 0xa35   :  { %v3095_v5 = vpop.eup %3094 }
 0xa36   :  { %1953 = vrot.lane.b32.xlu1 %v3095_v5, %s3133_s3 }
 0xa39   :  { %v3097_v26 = vpop.eup %3096 }
 0xa3a   :  { %1955 = vrot.lane.b32.xlu1 %v3097_v26, %s3133_s3 }
 0xa99   :  { %v1944_v31 = vpop.permute.xlu1 %1943 }
 0xa9a   :  { %v1966_v40 = vmul.f32 %v1944_v31, %v1926_v38  ;;  %v1942_v2 = vpop.permute.xlu0 %1941 }
 0xa9b   :  { %v1965_v3 = vmul.f32 %v1942_v2, %v1925_v11  ;;  %v3135_v11 = vmov 0  }
 0xa9c   :  { %v1982_v35 = vadd.f32 %v1974_v7, %v1966_v40  ;;  %3000 = vset.pattern.permute.xlu1 %v3135_v11  ;;  %3001 = vset.pattern.permute.xlu0 %v3135_v11 }
 0xa9d   :  { %v1981_v18 = vadd.f32 %v1973_v6, %v1965_v3  ;;  %v1948_v63 = vpop.permute.xlu1 %1947 }
 0xa9e   :  { %v1968_v42 = vmul.f32 %v1948_v63, %v1928_v1  ;;  %2003 = vrot.lane.b32.xlu1 %v1982_v35, %s3133_s3  ;;  %v1946_v33 = vpop.permute.xlu0 %1945 }
 0xa9f   :  { %v1967_v10 = vmul.f32 %v1946_v33, %v1927_v22  ;;  %2001 = vrot.lane.b32.xlu0 %v1981_v18, %s3133_s3 }
 0xaa0   :  { %v1984_v32 = vadd.f32 %v1976_v23, %v1968_v42 }
 0xaa1   :  { %v1983_v28 = vadd.f32 %v1975_v0, %v1967_v10 }
 0xaa2   :  { %2007 = vrot.lane.b32.xlu1 %v1984_v32, %s3133_s3  ;;  %v1950_v47 = vpop.permute.xlu0 %1949 }
 0xaa3   :  { %v1969_v12 = vmul.f32 %v1950_v47, %v1929_v46  ;;  %2005 = vrot.lane.b32.xlu0 %v1983_v28, %s3133_s3 }
 0xaa5   :  { %v1985_v48 = vadd.f32 %v1977_v37, %v1969_v12 }
 0xaa6   :  { %v1952_v20 = vpop.permute.xlu0 %1951 }
 0xaa7   :  { %v1970_v15 = vmul.f32 %v1952_v20, %v1930_v13  ;;  %2009 = vrot.lane.b32.xlu0 %v1985_v48, %s3133_s3 }
 0xaa8   :  { %v1954_v50 = vpop.permute.xlu1 %1953 }
 0xaa9   :  { %v1971_v17 = vmul.f32 %v1954_v50, %v1931_v8  ;;  %v1986_v43 = vadd.f32 %v1978_v49, %v1970_v15 }
 0xaab   :  { %v1987_v52 = vadd.f32 %v1979_v29, %v1971_v17  ;;  %2011 = vrot.lane.b32.xlu0 %v1986_v43, %s3133_s3 }
 0xaac   :  { %v1956_v54 = vpop.permute.xlu1 %1955 }
 0xaad   :  { %v1972_v36 = vmul.f32 %v1956_v54, %v1932_v53  ;;  %2013 = vrot.lane.b32.xlu1 %v1987_v52, %s3133_s3 }
 0xaaf   :  { %v1988_v61 = vadd.f32 %v1980_v41, %v1972_v36 }
 0xab1   :  { %2015 = vrot.lane.b32.xlu1 %v1988_v61, %s3133_s3 }
 0xb10   :  { %v2004_v25 = vpop.permute.xlu1 %2003 }
 0xb11   :  { %v2002_v55 = vpop.permute.xlu0 %2001 }
 0xb12   :  { %2859 = vmatprep.mubr.msk.f32.mxu0 %vm93_vm0, %v2002_v55 }
 0xb13   :  { %2860 = vmatmul.mubr.msk.f32.vlgmr.msra.gmra.mrb[48].mxu0 %vm93_vm0, %v2004_v25 }
 0xb14   :  { %v2008_v24 = vpop.permute.xlu1 %2007 }
 0xb15   :  { %v2006_v21 = vpop.permute.xlu0 %2005 }
 0xb16   :  { %2862 = vmatprep.mubr.msk.f32.mxu0 %vm93_vm0, %v2006_v21 }
 0xb17   :  { %2863 = vmatmul.mubr.msk.f32.gmra.mrb[50].mxu0 %vm93_vm0, %v2008_v24 }
 0xb19   :  { %v2010_v44 = vpop.permute.xlu0 %2009 }
 0xb1a   :  { %2865 = vmatprep.mubr.msk.f32.mxu0 %vm93_vm0, %v2010_v44 }
 0xb1d   :  { %v2012_v27 = vpop.permute.xlu0 %2011 }
 0xb1e   :  { %2866 = vmatmul.mubr.msk.f32.gmra.mrb[52].mxu0 %vm93_vm0, %v2012_v27 }
 0xb1f   :  { %v2014_v4 = vpop.permute.xlu1 %2013 }
 0xb20   :  { %2868 = vmatprep.mubr.msk.f32.mxu1 %vm93_vm0, %v2014_v4 }
 0xb23   :  { %v2016_v14 = vpop.permute.xlu1 %2015 }
 0xb24   :  { %2869 = vmatmul.mubr.msk.f32.vlgmr.msra.gmra.mrb[48].mxu1 %vm93_vm0, %v2016_v14 }
 0xbe6   :  { %v2861_v34 = vpop.f32.mrb[48].mxu0 }
 0xbe7   :  { %v4030_v19 = vadd.f32 %v2861_v34, %v1992_v56  ;;  %v2099_v57 = vpop.f32.mrb[49].mxu0 }
 0xbe8   :  { %v4032_v9 = vadd.f32 %v2099_v57, %v1992_v56 }
 0xbe9   :  { %2148 = vrot.lane.b32.xlu1 %v4030_v19, %s3134_s2 }
 0xbea   :  { %2146 = vrot.lane.b32.xlu0 %v4032_v9, %s3134_s2  ;;  %v2864_v62 = vpop.f32.mrb[50].mxu0 }
 0xbeb   :  { %v4036_v58 = vadd.f32 %v2864_v62, %v1992_v56  ;;  %v2109_v30 = vpop.f32.mrb[51].mxu0 }
 0xbec   :  { %v4038_v45 = vadd.f32 %v2109_v30, %v1992_v56 }
 0xbed   :  { %2152 = vrot.lane.b32.xlu1 %v4036_v58, %s3134_s2 }
 0xbee   :  { %2150 = vrot.lane.b32.xlu0 %v4038_v45, %s3134_s2 }
 0xbf1   :  { %v2867_v16 = vpop.f32.mrb[52].mxu0 }
 0xbf2   :  { %v4042_v51 = vadd.f32 %v2867_v16, %v1992_v56  ;;  %v2119_v59 = vpop.f32.mrb[53].mxu0 }
 0xbf3   :  { %v4044_v60 = vadd.f32 %v2119_v59, %v1992_v56 }
 0xbf4   :  { %2156 = vrot.lane.b32.xlu1 %v4042_v51, %s3134_s2 }
 0xbf5   :  { %2154 = vrot.lane.b32.xlu0 %v4044_v60, %s3134_s2 }
 0xbf7   :  { %v2870_v5 = vpop.f32.mrb[48].mxu1 }
 0xbf8   :  { %v4048_v26 = vadd.f32 %v2870_v5, %v1992_v56  ;;  %v2129_v38 = vpop.f32.mrb[49].mxu1 }
 0xbf9   :  { %v4050_v31 = vadd.f32 %v2129_v38, %v1992_v56 }
 0xbfa   :  { %2160 = vrot.lane.b32.xlu1 %v4048_v26, %s3134_s2 }
 0xbfb   :  { %2158 = vrot.lane.b32.xlu0 %v4050_v31, %s3134_s2 }
 0xc5b   :  { %v4054_v7 = vpop.permute.xlu1 %2148 }
 0xc5c   :  { %v2179_v40 = vsub.f32 %v4030_v19, %v4054_v7  ;;  %v4058_v2 = vpop.permute.xlu0 %2146  ;;  %v2171_v38 = vmax.f32 %v4030_v19, %v4054_v7 }
 0xc5d   :  { %v2178_v6 = vsub.f32 %v4032_v9, %v4058_v2 }
 0xc5e   :  { %v2187_v3 = vand.u32 2147483647, %v2179_v40  ;;  %v2170_v40 = vmax.f32 %v4032_v9, %v4058_v2 }
 0xc5f   :  { %v2186_v35 = vand.u32 2147483647, %v2178_v6  ;;  %v4062_v1 = vpop.permute.xlu1 %2152 }
 0xc60   :  { %v2195_v18 = vsub.f32 0.0, %v2187_v3  ;;  %v2181_v63 = vsub.f32 %v4036_v58, %v4062_v1  ;;  %v4066_v22 = vpop.permute.xlu0 %2150 }
 0xc61   :  { %v2194_v23 = vsub.f32 0.0, %v2186_v35  ;;  %v2180_v42 = vsub.f32 %v4038_v45, %v4066_v22  ;;  %v2172_v7 = vmax.f32 %v4038_v45, %v4066_v22 }
 0xc62   :  { %v2204_v33 = vmul.f32 1.442695, %v2195_v18  ;;  %v2189_v0 = vand.u32 2147483647, %v2181_v63 }
 0xc63   :  { %v2202_v10 = vmul.f32 1.442695, %v2194_v23  ;;  %v2188_v32 = vand.u32 2147483647, %v2180_v42  ;;  %v2173_v23 = vmax.f32 %v4036_v58, %v4062_v1 }
 0xc64   :  { %3098 = vpow2.f32 %v2204_v33  ;;  %v2197_v28 = vsub.f32 0.0, %v2189_v0 }
 0xc65   :  { %3100 = vpow2.f32 %v2202_v10  ;;  %v2196_v46 = vsub.f32 0.0, %v2188_v32 }
 0xc66   :  { %v2208_v47 = vmul.f32 1.442695, %v2197_v28  ;;  %v4070_v37 = vpop.permute.xlu1 %2156 }
 0xc67   :  { %v2206_v12 = vmul.f32 1.442695, %v2196_v46  ;;  %v2183_v48 = vsub.f32 %v4042_v51, %v4070_v37  ;;  %v4074_v13 = vpop.permute.xlu0 %2154  ;;  %v2175_v1 = vmax.f32 %v4042_v51, %v4070_v37 }
 0xc68   :  { %3102 = vpow2.f32 %v2208_v47  ;;  %v2182_v20 = vsub.f32 %v4044_v60, %v4074_v13  ;;  %v2174_v22 = vmax.f32 %v4044_v60, %v4074_v13 }
 0xc69   :  { %3104 = vpow2.f32 %v2206_v12  ;;  %v2191_v8 = vand.u32 2147483647, %v2183_v48 }
 0xc6a   :  { %v2190_v49 = vand.u32 2147483647, %v2182_v20 }
 0xc6b   :  { %v2199_v15 = vsub.f32 0.0, %v2191_v8 }
 0xc6c   :  { %v2198_v50 = vsub.f32 0.0, %v2190_v49  ;;  %v4078_v29 = vpop.permute.xlu1 %2160 }
 0xc6d   :  { %v2212_v17 = vmul.f32 1.442695, %v2199_v15  ;;  %v2185_v43 = vsub.f32 %v4048_v26, %v4078_v29  ;;  %v4082_v52 = vpop.permute.xlu0 %2158 }
 0xc6e   :  { %v3099_v53 = vpop.eup %3098  ;;  %v2210_v54 = vmul.f32 1.442695, %v2198_v50  ;;  %v2184_v41 = vsub.f32 %v4050_v31, %v4082_v52 }
 0xc6f   :  { %v3101_v36 = vpop.eup %3100  ;;  %v2219_v61 = vadd.f32 1.0, %v3099_v53  ;;  %3106 = vpow2.f32 %v2212_v17  ;;  %v2193_v25 = vand.u32 2147483647, %v2185_v43  ;;  %v2177_v17 = vmax.f32 %v4048_v26, %v4078_v29 }
 0xc70   :  { %v2218_v55 = vadd.f32 1.0, %v3101_v36  ;;  %3108 = vpow2.f32 %v2210_v54  ;;  %v2192_v21 = vand.u32 2147483647, %v2184_v41  ;;  %v2176_v53 = vmax.f32 %v4050_v31, %v4082_v52 }
 0xc71   :  { %3110 = vlog2.f32 %v2219_v61  ;;  %v2201_v24 = vsub.f32 0.0, %v2193_v25 }
 0xc72   :  { %v3103_v44 = vpop.eup %3102  ;;  %3112 = vlog2.f32 %v2218_v55  ;;  %v2200_v27 = vsub.f32 0.0, %v2192_v21 }
 0xc73   :  { %v3105_v4 = vpop.eup %3104  ;;  %v2221_v14 = vadd.f32 1.0, %v3103_v44  ;;  %v2216_v39 = vmul.f32 1.442695, %v2201_v24 }
 0xc74   :  { %v2220_v56 = vadd.f32 1.0, %v3105_v4  ;;  %v2214_v34 = vmul.f32 1.442695, %v2200_v27 }
 0xc75   :  { %3114 = vlog2.f32 %v2221_v14 }
 0xc76   :  { %3116 = vlog2.f32 %v2220_v56 }
 0xc77   :  { %3118 = vpow2.f32 %v2216_v39 }
 0xc78   :  { %3120 = vpow2.f32 %v2214_v34 }
 0xc79   :  { %v3107_v57 = vpop.eup %3106 }
 0xc7a   :  { %v3109_v62 = vpop.eup %3108  ;;  %v2223_v30 = vadd.f32 1.0, %v3107_v57 }
 0xc7b   :  { %v3111_v16 = vpop.eup %3110  ;;  %v2222_v59 = vadd.f32 1.0, %v3109_v62 }
 0xc7c   :  { %v3113_v5 = vpop.eup %3112  ;;  %v2229_v11 = vmul.f32 0.6931472, %v3111_v16  ;;  %3122 = vlog2.f32 %v2223_v30 }
 0xc7d   :  { %v2227_v6 = vmul.f32 0.6931472, %v3113_v5  ;;  %3124 = vlog2.f32 %v2222_v59 }
 0xc7e   :  { %v2243_v3 = vadd.f32 %v2229_v11, %v2171_v38 }
 0xc7f   :  { %v3115_v35 = vpop.eup %3114  ;;  %v2242_v18 = vadd.f32 %v2227_v6, %v2170_v40 }
 0xc80   :  { %v3117_v63 = vpop.eup %3116  ;;  %v2233_v42 = vmul.f32 0.6931472, %v3115_v35  ;;  %2257 = vperm.xlu1 %3000, %v2243_v3  }
 0xc81   :  { %v3119_v33 = vpop.eup %3118  ;;  %v2231_v0 = vmul.f32 0.6931472, %v3117_v63  ;;  %2252 = vperm.xlu0 %3001, %v2242_v18  }
 0xc82   :  { %v3121_v10 = vpop.eup %3120  ;;  %v2245_v32 = vadd.f32 %v2233_v42, %v2173_v23  ;;  %v2225_v2 = vadd.f32 1.0, %v3119_v33 }
 0xc83   :  { %v2244_v28 = vadd.f32 %v2231_v0, %v2172_v7  ;;  %v2224_v46 = vadd.f32 1.0, %v3121_v10 }
 0xc84   :  { %3126 = vlog2.f32 %v2225_v2 }
 0xc85   :  { %3128 = vlog2.f32 %v2224_v46  ;;  %2267 = vperm.xlu0 %3001, %v2245_v32   ;;  %2262 = vperm.xlu1 %3000, %v2244_v28  }
 0xc86   :  { %v3123_v47 = vpop.eup %3122 }
 0xc87   :  { %v3125_v12 = vpop.eup %3124  ;;  %v2237_v48 = vmul.f32 0.6931472, %v3123_v47 }
 0xc88   :  { %v2235_v20 = vmul.f32 0.6931472, %v3125_v12 }
 0xc89   :  { %v2247_v8 = vadd.f32 %v2237_v48, %v2175_v1 }
 0xc8a   :  { %v2246_v49 = vadd.f32 %v2235_v20, %v2174_v22 }
 0xc8b   :  { %2277 = vperm.xlu0 %3001, %v2247_v8  }
 0xc8c   :  { %2272 = vperm.xlu1 %3000, %v2246_v49  }
 0xc8e   :  { %v3127_v15 = vpop.eup %3126 }
 0xc8f   :  { %v3129_v50 = vpop.eup %3128  ;;  %v2241_v43 = vmul.f32 0.6931472, %v3127_v15 }
 0xc90   :  { %v2239_v54 = vmul.f32 0.6931472, %v3129_v50 }
 0xc91   :  { %v2249_v37 = vadd.f32 %v2241_v43, %v2177_v17 }
 0xc92   :  { %v2248_v41 = vadd.f32 %v2239_v54, %v2176_v53 }
 0xc93   :  { %2287 = vperm.xlu0 %3001, %v2249_v37  }
 0xc94   :  { %2282 = vperm.xlu1 %3000, %v2248_v41  }
 0xcff   :  { %v2258_v13 = vpop.permute.xlu1 %2257 }
 0xd00   :  { %v2291_v36 = vsub.f32 %v4030_v19, %v2258_v13  ;;  %v2253_v61 = vpop.permute.xlu0 %2252 }
 0xd01   :  { %v2290_v25 = vsub.f32 %v4032_v9, %v2253_v61 }
 0xd02   :  { %2300 = vst.msk [vmem:[%s4147_s5 + $0x8] sm:$0xff] %vm2298_vm2, %v2291_v36 }
 0xd03   :  { %2299 = vst.msk [vmem:[%s4147_s5] sm:$0xff] %vm2298_vm2, %v2290_v25 }
 0xd04   :  { %v2263_v29 = vpop.permute.xlu1 %2262  ;;  %v2268_v52 = vpop.permute.xlu0 %2267 }
 0xd05   :  { %v2292_v55 = vsub.f32 %v4038_v45, %v2263_v29  ;;  %v2293_v21 = vsub.f32 %v4036_v58, %v2268_v52 }
 0xd07   :  { %2301 = vst.msk [vmem:[%s4147_s5 + $0x10] sm:$0xff] %vm2298_vm2, %v2292_v55  ;;  %2302 = vst.msk [vmem:[%s4147_s5 + $0x18] sm:$0xff] %vm2298_vm2, %v2293_v21 }
 0xd0a   :  { %v2278_v19 = vpop.permute.xlu0 %2277 }
 0xd0b   :  { %v2295_v9 = vsub.f32 %v4042_v51, %v2278_v19  ;;  %v2273_v24 = vpop.permute.xlu1 %2272 }
 0xd0c   :  { %v2294_v44 = vsub.f32 %v4044_v60, %v2273_v24 }
 0xd0d   :  { %2304 = vst.msk [vmem:[%s4147_s5 + $0x28] sm:$0xff] %vm2298_vm2, %v2295_v9 }
 0xd0e   :  { %2303 = vst.msk [vmem:[%s4147_s5 + $0x20] sm:$0xff] %vm2298_vm2, %v2294_v44 }
 0xd12   :  { %v2288_v58 = vpop.permute.xlu0 %2287 }
 0xd13   :  { %v2297_v45 = vsub.f32 %v4048_v26, %v2288_v58  ;;  %v2283_v27 = vpop.permute.xlu1 %2282 }
 0xd14   :  { %v2296_v4 = vsub.f32 %v4050_v31, %v2283_v27 }
 0xd15   :  { %2306 = vst.msk [vmem:[%s4147_s5 + $0x38] sm:$0xff] %vm2298_vm2, %v2297_v45 }
 0xd16   :  { %2305 = vst.msk [vmem:[%s4147_s5 + $0x30] sm:$0xff] %vm2298_vm2, %v2296_v4 }

</bundles_post_ra>
